<compile_context>
chip_gen: v7x
topology: tpu7x:2x2x1
jax: 0.10.0
libtpu: 0.0.40
codegen_flags: <defaults>
</compile_context>

<pallas_src>
import math

import numpy as np
import jax
import jax.numpy as jnp
from jax import lax
from jax.experimental import pallas as pl
from jax.experimental.pallas import tpu as pltpu


def _make_cru_kernel(img_w: int, ksize: int):
    """Build the kernel closure for a given image width and conv kernel size."""
    half = ksize // 2
    pad = half * img_w + half          # flat-index padding covering all tap shifts
    prec = lax.Precision.HIGHEST

    def kernel(x_ref, wsq1_ref, wsq2_ref, wg_ref, bias_ref, wy2_ref, mask_ref, o_ref):
        # x_ref:    (TB, C, HW)      input block
        # wsq1_ref: (usc, C)         squeeze1 folded to full-channel 1x1
        # wsq2_ref: (lsc, C)         squeeze2 folded to full-channel 1x1
        # wg_ref:   (K*K, C, usc)    dense per-tap GWC weights (+ PWC1 in center tap)
        # bias_ref: (C, 1)           GWC bias
        # wy2_ref:  (C, lsc)         [PWC2 ; I] -> Y2 = cat([PWC2(low_s), low_s])
        # mask_ref: (K*K, 1, HW)     x-wrap validity mask per tap
        # o_ref:    (TB, C, HW)
        tb, c, hw = x_ref.shape
        inv_hw = 1.0 / float(hw)

        for b in range(tb):                                   # TB is small & static
            xb = x_ref[b]                                     # (C, HW), native dtype

            up_sq = jnp.dot(wsq1_ref[...], xb,
                            preferred_element_type=jnp.float32, precision=prec)
            low_sq = jnp.dot(wsq2_ref[...], xb,
                             preferred_element_type=jnp.float32, precision=prec)

            # Grouped KxK conv (zero padded) + PWC1, as K*K shifted matmuls.
            padded = jnp.pad(up_sq, ((0, 0), (pad, pad)))     # (usc, HW + 2*pad)
            acc = jnp.zeros((c, hw), jnp.float32)
            for dy in range(ksize):
                for dx in range(ksize):
                    t = dy * ksize + dx
                    s = (dy - half) * img_w + (dx - half)
                    sh = padded[:, pad + s: pad + s + hw]     # (usc, HW)
                    if dx != half:                            # zero x-wrapped columns
                        sh = sh * mask_ref[t]
                    acc = acc + jnp.dot(wg_ref[t], sh,
                                        preferred_element_type=jnp.float32,
                                        precision=prec)
            y1 = acc + bias_ref[...]                          # (C, HW)

            # Y2 = cat([PWC2(low_sq), low_sq]) folded into one matmul.
            y2 = jnp.dot(wy2_ref[...], low_sq,
                         preferred_element_type=jnp.float32, precision=prec)

            # softmax(global-avg-pool(cat([Y1, Y2]))) over the 2C channels.
            p1 = jnp.sum(y1, axis=1, keepdims=True) * inv_hw  # (C, 1)
            p2 = jnp.sum(y2, axis=1, keepdims=True) * inv_hw  # (C, 1)
            m = jnp.maximum(jnp.max(p1, axis=0, keepdims=True),
                            jnp.max(p2, axis=0, keepdims=True))         # (1, 1)
            e1 = jnp.exp(p1 - m)
            e2 = jnp.exp(p2 - m)
            denom = (jnp.sum(e1, axis=0, keepdims=True)
                     + jnp.sum(e2, axis=0, keepdims=True))               # (1, 1)
            a1 = e1 / denom                                              # (C, 1)
            a2 = e2 / denom

            # out1 + out2 after the channel split of the 2C-channel tensor.
            o_ref[b] = (a1 * y1 + a2 * y2).astype(o_ref.dtype)

    return kernel


def _pick_tb(batch, slab_bytes, target_bytes=2 * 1024 * 1024, max_tb=8):
    """Largest divisor of batch s.t. the block fits the byte target and grid >= 2."""
    tb = 1
    for cand in range(1, min(batch, max_tb) + 1):
        if batch % cand != 0:
            continue
        if cand * slab_bytes > target_bytes:
            continue
        if batch >= 2 and batch // cand < 2:   # keep >= 2 grid steps (v7x: 2 TCs)
            continue
        tb = cand
    return tb


def cru_forward(x, w_sq1, w_sq2, w_gwc, b_gwc, w_pwc1, w_pwc2):
    """CRU forward.

    x      : (B, C, H, W)            NCHW input
    w_sq1  : (usc, up_ch)            squeeze1 1x1 weight (bias=False)
    w_sq2  : (lsc, low_ch)           squeeze2 1x1 weight (bias=False)
    w_gwc  : (C, usc//groups, K, K)  grouped conv weight (bias below)
    b_gwc  : (C,)                    grouped conv bias
    w_pwc1 : (C, usc)                PWC1 1x1 weight (bias=False)
    w_pwc2 : (C - lsc, lsc)          PWC2 1x1 weight (bias=False)
    """
    B, C, H, W = x.shape
    HW = H * W
    usc, up_ch = w_sq1.shape
    lsc, low_ch = w_sq2.shape
    assert up_ch + low_ch == C
    K = w_gwc.shape[2]
    cig = w_gwc.shape[1]
    groups = usc // cig
    cog = C // groups

    # ---- fold weights so every channel op is a dense matmul in-kernel ----
    wsq1f = np.zeros((usc, C), np.float32)
    wsq1f[:, :up_ch] = np.asarray(w_sq1, np.float32)
    wsq2f = np.zeros((lsc, C), np.float32)
    wsq2f[:, up_ch:] = np.asarray(w_sq2, np.float32)

    wg_np = np.asarray(w_gwc, np.float32)                       # (C, cig, K, K)
    wg_dense = np.zeros((K, K, C, usc), np.float32)
    for g in range(groups):
        wg_dense[:, :, g * cog:(g + 1) * cog, g * cig:(g + 1) * cig] = \
            np.transpose(wg_np[g * cog:(g + 1) * cog], (2, 3, 0, 1))
    wg_dense = wg_dense.reshape(K * K, C, usc)
    wg_dense[(K // 2) * K + (K // 2)] += np.asarray(w_pwc1, np.float32)  # fuse PWC1

    wy2 = np.zeros((C, lsc), np.float32)
    wy2[:C - lsc] = np.asarray(w_pwc2, np.float32)
    wy2[C - lsc:] = np.eye(lsc, dtype=np.float32)               # "cat low_s" rows

    bias2d = np.asarray(b_gwc, np.float32).reshape(C, 1)

    # Column-validity masks for the flattened-HW tap shifts (zero the x-wrap lanes).
    cols = np.arange(HW, dtype=np.int64) % W
    masks = np.zeros((K * K, 1, HW), np.float32)
    for dy in range(K):
        for dx in range(K):
            sx = dx - K // 2
            masks[dy * K + dx, 0] = ((cols + sx >= 0) & (cols + sx < W)).astype(np.float32)

    # ---- block / grid sizing (mem-bound: big lane-dense blocks, grid >= 2) ----
    itemsize = x.dtype.itemsize
    slab = C * HW * itemsize
    tb = _pick_tb(B, slab)
    grid = (B // tb,)

    x2 = x.reshape(B, C, HW)

    flops = 2 * B * HW * C * (usc + lsc + (K * K) * usc + lsc) + 8 * B * C * HW
    cost = pl.CostEstimate(flops=flops,
                           transcendentals=2 * B * C,
                           bytes_accessed=2 * B * C * HW * itemsize)

    kernel = _make_cru_kernel(W, K)
    out2 = pl.pallas_call(
        kernel,
        out_shape=jax.ShapeDtypeStruct((B, C, HW), x.dtype),
        grid=grid,
        in_specs=[
            pl.BlockSpec((tb, C, HW), lambda i: (i, 0, 0)),
            pl.BlockSpec((usc, C), lambda i: (0, 0)),
            pl.BlockSpec((lsc, C), lambda i: (0, 0)),
            pl.BlockSpec((K * K, C, usc), lambda i: (0, 0, 0)),
            pl.BlockSpec((C, 1), lambda i: (0, 0)),
            pl.BlockSpec((C, lsc), lambda i: (0, 0)),
            pl.BlockSpec((K * K, 1, HW), lambda i: (0, 0, 0)),
        ],
        out_specs=pl.BlockSpec((tb, C, HW), lambda i: (i, 0, 0)),
        compiler_params=pltpu.CompilerParams(
            dimension_semantics=("parallel",),
            vmem_limit_bytes=48 * 1024 * 1024),
        cost_estimate=cost,
    )(x2, jnp.asarray(wsq1f), jnp.asarray(wsq2f), jnp.asarray(wg_dense),
      jnp.asarray(bias2d), jnp.asarray(wy2), jnp.asarray(masks))

    return out2.reshape(B, C, H, W)


if __name__ == "__main__":
    # Small shapes consistent with the module.
    op_channel = 16
    alpha = 0.5
    squeeze_radio = 2
    group_size = 2
    group_kernel_size = 3
    B, H, W = 2, 16, 16

    up_ch = int(alpha * op_channel)
    low_ch = op_channel - up_ch
    usc = up_ch // squeeze_radio
    lsc = low_ch // squeeze_radio
    cig = usc // group_size

    key = jax.random.PRNGKey(0)
    ks = jax.random.split(key, 8)

    def uinit(k, shape, fan_in):
        bound = 1.0 / math.sqrt(fan_in)
        return jax.random.uniform(k, shape, jnp.float32, -bound, bound)

    x = jax.random.normal(ks[0], (B, op_channel, H, W), jnp.float32)
    w_sq1 = uinit(ks[1], (usc, up_ch), up_ch)
    w_sq2 = uinit(ks[2], (lsc, low_ch), low_ch)
    w_gwc = uinit(ks[3], (op_channel, cig, group_kernel_size, group_kernel_size),
                  cig * group_kernel_size * group_kernel_size)
    b_gwc = uinit(ks[4], (op_channel,), cig * group_kernel_size * group_kernel_size)
    w_pwc1 = uinit(ks[5], (op_channel, usc), usc)
    w_pwc2 = uinit(ks[6], (op_channel - lsc, lsc), lsc)

    out = cru_forward(x, w_sq1, w_sq2, w_gwc, b_gwc, w_pwc1, w_pwc2)
    jax.block_until_ready(out)

    # ---- pure-JAX reference mirroring the PyTorch forward ----
    prec = lax.Precision.HIGHEST

    def conv1x1(inp, w):
        return jnp.einsum('oi,bihw->bohw', w, inp, precision=prec)

    up, low = x[:, :up_ch], x[:, up_ch:]
    up_s, low_s = conv1x1(up, w_sq1), conv1x1(low, w_sq2)
    gwc = lax.conv_general_dilated(
        up_s, w_gwc, window_strides=(1, 1),
        padding=((group_kernel_size // 2,) * 2,) * 2,
        dimension_numbers=('NCHW', 'OIHW', 'NCHW'),
        feature_group_count=group_size, precision=prec)
    gwc = gwc + b_gwc[None, :, None, None]
    y1 = gwc + conv1x1(up_s, w_pwc1)
    y2 = jnp.concatenate([conv1x1(low_s, w_pwc2), low_s], axis=1)
    both = jnp.concatenate([y1, y2], axis=1)
    attn = jax.nn.softmax(jnp.mean(both, axis=(2, 3), keepdims=True), axis=1)
    both = attn * both
    ref = both[:, :op_channel] + both[:, op_channel:]

    assert out.shape == x.shape and out.dtype == x.dtype
    err = float(jnp.max(jnp.abs(out - ref)))
    assert jnp.allclose(out, ref, atol=1e-4, rtol=1e-4), err
    print("KERNEL_OK")
</pallas_src>

<mosaic_0001>
module attributes {stable_mosaic.version = 11 : i64} {
  func.func @kernel(%arg0: i32, %arg1: memref<1x16x256xf32, #tpu.memory_space<vmem>>, %arg2: memref<4x16xf32, #tpu.memory_space<vmem>>, %arg3: memref<4x16xf32, #tpu.memory_space<vmem>>, %arg4: memref<9x16x4xf32, #tpu.memory_space<vmem>>, %arg5: memref<16x1xf32, #tpu.memory_space<vmem>>, %arg6: memref<16x4xf32, #tpu.memory_space<vmem>>, %arg7: memref<9x1x256xf32, #tpu.memory_space<vmem>>, %arg8: memref<1x16x256xf32, #tpu.memory_space<vmem>>) attributes {dimension_semantics = [#tpu.dimension_semantics<parallel>], iteration_bounds = array<i64: 2>, scalar_prefetch = 0 : i64, scratch_operands = 0 : i64, tpu.core_type = #tpu.core_type<tc>, window_params = [{transform_indices = @transform_0, window_bounds = array<i64: 1, 16, 256>}, {pipeline_mode = #tpu.pipeline_mode<synchronous>, transform_indices = @transform_1, window_bounds = array<i64: 4, 16>}, {pipeline_mode = #tpu.pipeline_mode<synchronous>, transform_indices = @transform_2, window_bounds = array<i64: 4, 16>}, {pipeline_mode = #tpu.pipeline_mode<synchronous>, transform_indices = @transform_3, window_bounds = array<i64: 9, 16, 4>}, {pipeline_mode = #tpu.pipeline_mode<synchronous>, transform_indices = @transform_4, window_bounds = array<i64: 16, 1>}, {pipeline_mode = #tpu.pipeline_mode<synchronous>, transform_indices = @transform_5, window_bounds = array<i64: 16, 4>}, {pipeline_mode = #tpu.pipeline_mode<synchronous>, transform_indices = @transform_6, window_bounds = array<i64: 9, 1, 256>}, {transform_indices = @transform_7, window_bounds = array<i64: 1, 16, 256>}]} {
    %c0 = arith.constant 0 : index
    %c0_0 = arith.constant 0 : index
    %c0_1 = arith.constant 0 : index
    %0 = vector.load %arg1[%c0, %c0_0, %c0_1] : memref<1x16x256xf32, #tpu.memory_space<vmem>>, vector<1x16x256xf32>
    %1 = vector.shape_cast %0 : vector<1x16x256xf32> to vector<16x256xf32>
    %c0_2 = arith.constant 0 : index
    %c0_3 = arith.constant 0 : index
    %2 = vector.load %arg2[%c0_2, %c0_3] : memref<4x16xf32, #tpu.memory_space<vmem>>, vector<4x16xf32>
    %cst = arith.constant dense<0.000000e+00> : vector<4x256xf32>
    %3 = tpu.matmul %2, %1, %cst {dimension_numbers = #tpu.dot_dimension_numbers<[1], [0], [0], [1], [0, 0, 1, 1], [], []>, precision = #tpu.contract_precision<fp32>} : vector<4x16xf32>, vector<16x256xf32>, vector<4x256xf32> -> vector<4x256xf32>
    %c0_4 = arith.constant 0 : index
    %c0_5 = arith.constant 0 : index
    %4 = vector.load %arg3[%c0_4, %c0_5] : memref<4x16xf32, #tpu.memory_space<vmem>>, vector<4x16xf32>
    %cst_6 = arith.constant dense<0.000000e+00> : vector<4x256xf32>
    %5 = tpu.matmul %4, %1, %cst_6 {dimension_numbers = #tpu.dot_dimension_numbers<[1], [0], [0], [1], [0, 0, 1, 1], [], []>, precision = #tpu.contract_precision<fp32>} : vector<4x16xf32>, vector<16x256xf32>, vector<4x256xf32> -> vector<4x256xf32>
    %c0_i32 = arith.constant 0 : i32
    %6 = arith.sitofp %c0_i32 : i32 to f32
    %7 = vector.broadcast %6 : f32 to vector<4x17xf32>
    %8 = tpu.concatenate %7, %3 in 1 : vector<4x17xf32>, vector<4x256xf32> -> vector<4x273xf32>
    %9 = vector.broadcast %6 : f32 to vector<4x17xf32>
    %10 = tpu.concatenate %8, %9 in 1 : vector<4x273xf32>, vector<4x17xf32> -> vector<4x290xf32>
    %cst_7 = arith.constant 0.000000e+00 : f32
    %11 = vector.broadcast %cst_7 : f32 to vector<16x256xf32>
    %12 = vector.extract_strided_slice %10 {offsets = [0, 0], sizes = [4, 256], strides = [1, 1]} : vector<4x290xf32> to vector<4x256xf32>
    %c0_8 = arith.constant 0 : index
    %c0_9 = arith.constant 0 : index
    %c0_10 = arith.constant 0 : index
    %13 = vector.load %arg7[%c0_8, %c0_9, %c0_10] : memref<9x1x256xf32, #tpu.memory_space<vmem>>, vector<1x1x256xf32>
    %14 = vector.shape_cast %13 : vector<1x1x256xf32> to vector<1x256xf32>
    %15 = vector.broadcast %14 : vector<1x256xf32> to vector<4x256xf32>
    %16 = arith.mulf %12, %15 : vector<4x256xf32>
    %c0_11 = arith.constant 0 : index
    %c0_12 = arith.constant 0 : index
    %c0_13 = arith.constant 0 : index
    %17 = vector.load %arg4[%c0_11, %c0_12, %c0_13] : memref<9x16x4xf32, #tpu.memory_space<vmem>>, vector<1x16x4xf32>
    %18 = vector.shape_cast %17 : vector<1x16x4xf32> to vector<16x4xf32>
    %cst_14 = arith.constant dense<0.000000e+00> : vector<16x256xf32>
    %19 = tpu.matmul %18, %16, %cst_14 {dimension_numbers = #tpu.dot_dimension_numbers<[1], [0], [0], [1], [0, 0, 1, 1], [], []>, precision = #tpu.contract_precision<fp32>} : vector<16x4xf32>, vector<4x256xf32>, vector<16x256xf32> -> vector<16x256xf32>
    %20 = arith.addf %11, %19 : vector<16x256xf32>
    %21 = vector.extract_strided_slice %10 {offsets = [0, 1], sizes = [4, 256], strides = [1, 1]} : vector<4x290xf32> to vector<4x256xf32>
    %c1 = arith.constant 1 : index
    %c0_15 = arith.constant 0 : index
    %c0_16 = arith.constant 0 : index
    %22 = vector.load %arg4[%c1, %c0_15, %c0_16] : memref<9x16x4xf32, #tpu.memory_space<vmem>>, vector<1x16x4xf32>
    %23 = vector.shape_cast %22 : vector<1x16x4xf32> to vector<16x4xf32>
    %cst_17 = arith.constant dense<0.000000e+00> : vector<16x256xf32>
    %24 = tpu.matmul %23, %21, %cst_17 {dimension_numbers = #tpu.dot_dimension_numbers<[1], [0], [0], [1], [0, 0, 1, 1], [], []>, precision = #tpu.contract_precision<fp32>} : vector<16x4xf32>, vector<4x256xf32>, vector<16x256xf32> -> vector<16x256xf32>
    %25 = arith.addf %20, %24 : vector<16x256xf32>
    %26 = vector.extract_strided_slice %10 {offsets = [0, 2], sizes = [4, 256], strides = [1, 1]} : vector<4x290xf32> to vector<4x256xf32>
    %c2 = arith.constant 2 : index
    %c0_18 = arith.constant 0 : index
    %c0_19 = arith.constant 0 : index
    %27 = vector.load %arg7[%c2, %c0_18, %c0_19] : memref<9x1x256xf32, #tpu.memory_space<vmem>>, vector<1x1x256xf32>
    %28 = vector.shape_cast %27 : vector<1x1x256xf32> to vector<1x256xf32>
    %29 = vector.broadcast %28 : vector<1x256xf32> to vector<4x256xf32>
    %30 = arith.mulf %26, %29 : vector<4x256xf32>
    %c2_20 = arith.constant 2 : index
    %c0_21 = arith.constant 0 : index
    %c0_22 = arith.constant 0 : index
    %31 = vector.load %arg4[%c2_20, %c0_21, %c0_22] : memref<9x16x4xf32, #tpu.memory_space<vmem>>, vector<1x16x4xf32>
    %32 = vector.shape_cast %31 : vector<1x16x4xf32> to vector<16x4xf32>
    %cst_23 = arith.constant dense<0.000000e+00> : vector<16x256xf32>
    %33 = tpu.matmul %32, %30, %cst_23 {dimension_numbers = #tpu.dot_dimension_numbers<[1], [0], [0], [1], [0, 0, 1, 1], [], []>, precision = #tpu.contract_precision<fp32>} : vector<16x4xf32>, vector<4x256xf32>, vector<16x256xf32> -> vector<16x256xf32>
    %34 = arith.addf %25, %33 : vector<16x256xf32>
    %35 = vector.extract_strided_slice %10 {offsets = [0, 16], sizes = [4, 256], strides = [1, 1]} : vector<4x290xf32> to vector<4x256xf32>
    %c3 = arith.constant 3 : index
    %c0_24 = arith.constant 0 : index
    %c0_25 = arith.constant 0 : index
    %36 = vector.load %arg7[%c3, %c0_24, %c0_25] : memref<9x1x256xf32, #tpu.memory_space<vmem>>, vector<1x1x256xf32>
    %37 = vector.shape_cast %36 : vector<1x1x256xf32> to vector<1x256xf32>
    %38 = vector.broadcast %37 : vector<1x256xf32> to vector<4x256xf32>
    %39 = arith.mulf %35, %38 : vector<4x256xf32>
    %c3_26 = arith.constant 3 : index
    %c0_27 = arith.constant 0 : index
    %c0_28 = arith.constant 0 : index
    %40 = vector.load %arg4[%c3_26, %c0_27, %c0_28] : memref<9x16x4xf32, #tpu.memory_space<vmem>>, vector<1x16x4xf32>
    %41 = vector.shape_cast %40 : vector<1x16x4xf32> to vector<16x4xf32>
    %cst_29 = arith.constant dense<0.000000e+00> : vector<16x256xf32>
    %42 = tpu.matmul %41, %39, %cst_29 {dimension_numbers = #tpu.dot_dimension_numbers<[1], [0], [0], [1], [0, 0, 1, 1], [], []>, precision = #tpu.contract_precision<fp32>} : vector<16x4xf32>, vector<4x256xf32>, vector<16x256xf32> -> vector<16x256xf32>
    %43 = arith.addf %34, %42 : vector<16x256xf32>
    %44 = vector.extract_strided_slice %10 {offsets = [0, 17], sizes = [4, 256], strides = [1, 1]} : vector<4x290xf32> to vector<4x256xf32>
    %c4 = arith.constant 4 : index
    %c0_30 = arith.constant 0 : index
    %c0_31 = arith.constant 0 : index
    %45 = vector.load %arg4[%c4, %c0_30, %c0_31] : memref<9x16x4xf32, #tpu.memory_space<vmem>>, vector<1x16x4xf32>
    %46 = vector.shape_cast %45 : vector<1x16x4xf32> to vector<16x4xf32>
    %cst_32 = arith.constant dense<0.000000e+00> : vector<16x256xf32>
    %47 = tpu.matmul %46, %44, %cst_32 {dimension_numbers = #tpu.dot_dimension_numbers<[1], [0], [0], [1], [0, 0, 1, 1], [], []>, precision = #tpu.contract_precision<fp32>} : vector<16x4xf32>, vector<4x256xf32>, vector<16x256xf32> -> vector<16x256xf32>
    %48 = arith.addf %43, %47 : vector<16x256xf32>
    %49 = vector.extract_strided_slice %10 {offsets = [0, 18], sizes = [4, 256], strides = [1, 1]} : vector<4x290xf32> to vector<4x256xf32>
    %c5 = arith.constant 5 : index
    %c0_33 = arith.constant 0 : index
    %c0_34 = arith.constant 0 : index
    %50 = vector.load %arg7[%c5, %c0_33, %c0_34] : memref<9x1x256xf32, #tpu.memory_space<vmem>>, vector<1x1x256xf32>
    %51 = vector.shape_cast %50 : vector<1x1x256xf32> to vector<1x256xf32>
    %52 = vector.broadcast %51 : vector<1x256xf32> to vector<4x256xf32>
    %53 = arith.mulf %49, %52 : vector<4x256xf32>
    %c5_35 = arith.constant 5 : index
    %c0_36 = arith.constant 0 : index
    %c0_37 = arith.constant 0 : index
    %54 = vector.load %arg4[%c5_35, %c0_36, %c0_37] : memref<9x16x4xf32, #tpu.memory_space<vmem>>, vector<1x16x4xf32>
    %55 = vector.shape_cast %54 : vector<1x16x4xf32> to vector<16x4xf32>
    %cst_38 = arith.constant dense<0.000000e+00> : vector<16x256xf32>
    %56 = tpu.matmul %55, %53, %cst_38 {dimension_numbers = #tpu.dot_dimension_numbers<[1], [0], [0], [1], [0, 0, 1, 1], [], []>, precision = #tpu.contract_precision<fp32>} : vector<16x4xf32>, vector<4x256xf32>, vector<16x256xf32> -> vector<16x256xf32>
    %57 = arith.addf %48, %56 : vector<16x256xf32>
    %58 = vector.extract_strided_slice %10 {offsets = [0, 32], sizes = [4, 256], strides = [1, 1]} : vector<4x290xf32> to vector<4x256xf32>
    %c6 = arith.constant 6 : index
    %c0_39 = arith.constant 0 : index
    %c0_40 = arith.constant 0 : index
    %59 = vector.load %arg7[%c6, %c0_39, %c0_40] : memref<9x1x256xf32, #tpu.memory_space<vmem>>, vector<1x1x256xf32>
    %60 = vector.shape_cast %59 : vector<1x1x256xf32> to vector<1x256xf32>
    %61 = vector.broadcast %60 : vector<1x256xf32> to vector<4x256xf32>
    %62 = arith.mulf %58, %61 : vector<4x256xf32>
    %c6_41 = arith.constant 6 : index
    %c0_42 = arith.constant 0 : index
    %c0_43 = arith.constant 0 : index
    %63 = vector.load %arg4[%c6_41, %c0_42, %c0_43] : memref<9x16x4xf32, #tpu.memory_space<vmem>>, vector<1x16x4xf32>
    %64 = vector.shape_cast %63 : vector<1x16x4xf32> to vector<16x4xf32>
    %cst_44 = arith.constant dense<0.000000e+00> : vector<16x256xf32>
    %65 = tpu.matmul %64, %62, %cst_44 {dimension_numbers = #tpu.dot_dimension_numbers<[1], [0], [0], [1], [0, 0, 1, 1], [], []>, precision = #tpu.contract_precision<fp32>} : vector<16x4xf32>, vector<4x256xf32>, vector<16x256xf32> -> vector<16x256xf32>
    %66 = arith.addf %57, %65 : vector<16x256xf32>
    %67 = vector.extract_strided_slice %10 {offsets = [0, 33], sizes = [4, 256], strides = [1, 1]} : vector<4x290xf32> to vector<4x256xf32>
    %c7 = arith.constant 7 : index
    %c0_45 = arith.constant 0 : index
    %c0_46 = arith.constant 0 : index
    %68 = vector.load %arg4[%c7, %c0_45, %c0_46] : memref<9x16x4xf32, #tpu.memory_space<vmem>>, vector<1x16x4xf32>
    %69 = vector.shape_cast %68 : vector<1x16x4xf32> to vector<16x4xf32>
    %cst_47 = arith.constant dense<0.000000e+00> : vector<16x256xf32>
    %70 = tpu.matmul %69, %67, %cst_47 {dimension_numbers = #tpu.dot_dimension_numbers<[1], [0], [0], [1], [0, 0, 1, 1], [], []>, precision = #tpu.contract_precision<fp32>} : vector<16x4xf32>, vector<4x256xf32>, vector<16x256xf32> -> vector<16x256xf32>
    %71 = arith.addf %66, %70 : vector<16x256xf32>
    %72 = vector.extract_strided_slice %10 {offsets = [0, 34], sizes = [4, 256], strides = [1, 1]} : vector<4x290xf32> to vector<4x256xf32>
    %c8 = arith.constant 8 : index
    %c0_48 = arith.constant 0 : index
    %c0_49 = arith.constant 0 : index
    %73 = vector.load %arg7[%c8, %c0_48, %c0_49] : memref<9x1x256xf32, #tpu.memory_space<vmem>>, vector<1x1x256xf32>
    %74 = vector.shape_cast %73 : vector<1x1x256xf32> to vector<1x256xf32>
    %75 = vector.broadcast %74 : vector<1x256xf32> to vector<4x256xf32>
    %76 = arith.mulf %72, %75 : vector<4x256xf32>
    %c8_50 = arith.constant 8 : index
    %c0_51 = arith.constant 0 : index
    %c0_52 = arith.constant 0 : index
    %77 = vector.load %arg4[%c8_50, %c0_51, %c0_52] : memref<9x16x4xf32, #tpu.memory_space<vmem>>, vector<1x16x4xf32>
    %78 = vector.shape_cast %77 : vector<1x16x4xf32> to vector<16x4xf32>
    %cst_53 = arith.constant dense<0.000000e+00> : vector<16x256xf32>
    %79 = tpu.matmul %78, %76, %cst_53 {dimension_numbers = #tpu.dot_dimension_numbers<[1], [0], [0], [1], [0, 0, 1, 1], [], []>, precision = #tpu.contract_precision<fp32>} : vector<16x4xf32>, vector<4x256xf32>, vector<16x256xf32> -> vector<16x256xf32>
    %80 = arith.addf %71, %79 : vector<16x256xf32>
    %c0_54 = arith.constant 0 : index
    %c0_55 = arith.constant 0 : index
    %81 = vector.load %arg5[%c0_54, %c0_55] : memref<16x1xf32, #tpu.memory_space<vmem>>, vector<16x1xf32>
    %82 = vector.broadcast %81 : vector<16x1xf32> to vector<16x256xf32>
    %83 = arith.addf %80, %82 : vector<16x256xf32>
    %c0_56 = arith.constant 0 : index
    %c0_57 = arith.constant 0 : index
    %84 = vector.load %arg6[%c0_56, %c0_57] : memref<16x4xf32, #tpu.memory_space<vmem>>, vector<16x4xf32>
    %cst_58 = arith.constant dense<0.000000e+00> : vector<16x256xf32>
    %85 = tpu.matmul %84, %5, %cst_58 {dimension_numbers = #tpu.dot_dimension_numbers<[1], [0], [0], [1], [0, 0, 1, 1], [], []>, precision = #tpu.contract_precision<fp32>} : vector<16x4xf32>, vector<4x256xf32>, vector<16x256xf32> -> vector<16x256xf32>
    %cst_59 = arith.constant dense<0.000000e+00> : vector<16xf32>
    %86 = vector.multi_reduction <add>, %83, %cst_59 [1] : vector<16x256xf32> to vector<16xf32>
    %87 = vector.shape_cast %86 : vector<16xf32> to vector<16x1xf32>
    %cst_60 = arith.constant 3.906250e-03 : f32
    %88 = vector.broadcast %cst_60 : f32 to vector<16x1xf32>
    %89 = arith.mulf %87, %88 : vector<16x1xf32>
    %cst_61 = arith.constant dense<0.000000e+00> : vector<16xf32>
    %90 = vector.multi_reduction <add>, %85, %cst_61 [1] : vector<16x256xf32> to vector<16xf32>
    %91 = vector.shape_cast %90 : vector<16xf32> to vector<16x1xf32>
    %cst_62 = arith.constant 3.906250e-03 : f32
    %92 = vector.broadcast %cst_62 : f32 to vector<16x1xf32>
    %93 = arith.mulf %91, %92 : vector<16x1xf32>
    %cst_63 = arith.constant dense<0xFF800000> : vector<1xf32>
    %94 = vector.multi_reduction <maximumf>, %89, %cst_63 [0] : vector<16x1xf32> to vector<1xf32>
    %95 = vector.shape_cast %94 : vector<1xf32> to vector<1x1xf32>
    %cst_64 = arith.constant dense<0xFF800000> : vector<1xf32>
    %96 = vector.multi_reduction <maximumf>, %93, %cst_64 [0] : vector<16x1xf32> to vector<1xf32>
    %97 = vector.shape_cast %96 : vector<1xf32> to vector<1x1xf32>
    %98 = arith.maximumf %95, %97 : vector<1x1xf32>
    %99 = vector.broadcast %98 : vector<1x1xf32> to vector<16x1xf32>
    %100 = arith.subf %89, %99 : vector<16x1xf32>
    %101 = math.exp %100 : vector<16x1xf32>
    %102 = vector.broadcast %98 : vector<1x1xf32> to vector<16x1xf32>
    %103 = arith.subf %93, %102 : vector<16x1xf32>
    %104 = math.exp %103 : vector<16x1xf32>
    %cst_65 = arith.constant dense<0.000000e+00> : vector<1xf32>
    %105 = vector.multi_reduction <add>, %101, %cst_65 [0] : vector<16x1xf32> to vector<1xf32>
    %106 = vector.shape_cast %105 : vector<1xf32> to vector<1x1xf32>
    %cst_66 = arith.constant dense<0.000000e+00> : vector<1xf32>
    %107 = vector.multi_reduction <add>, %104, %cst_66 [0] : vector<16x1xf32> to vector<1xf32>
    %108 = vector.shape_cast %107 : vector<1xf32> to vector<1x1xf32>
    %109 = arith.addf %106, %108 : vector<1x1xf32>
    %110 = vector.broadcast %109 : vector<1x1xf32> to vector<16x1xf32>
    %111 = arith.divf %101, %110 : vector<16x1xf32>
    %112 = vector.broadcast %109 : vector<1x1xf32> to vector<16x1xf32>
    %113 = arith.divf %104, %112 : vector<16x1xf32>
    %114 = vector.broadcast %111 : vector<16x1xf32> to vector<16x256xf32>
    %115 = arith.mulf %114, %83 : vector<16x256xf32>
    %116 = vector.broadcast %113 : vector<16x1xf32> to vector<16x256xf32>
    %117 = arith.mulf %116, %85 : vector<16x256xf32>
    %118 = arith.addf %115, %117 : vector<16x256xf32>
    %c0_67 = arith.constant 0 : index
    %c0_68 = arith.constant 0 : index
    %c0_69 = arith.constant 0 : index
    %119 = vector.load %arg8[%c0_67, %c0_68, %c0_69] : memref<1x16x256xf32, #tpu.memory_space<vmem>>, vector<1x16x256xf32>
    %120 = vector.shape_cast %119 : vector<1x16x256xf32> to vector<16x256xf32>
    %121 = vector.shape_cast %118 : vector<16x256xf32> to vector<1x16x256xf32>
    tpu.vector_store %arg8[%c0_67, %c0_68, %c0_69], %121 {strides = array<i32>} : memref<1x16x256xf32, #tpu.memory_space<vmem>>, vector<1x16x256xf32>,
    return
  }
  func.func @transform_0(%arg0: i32) -> (i32, i32, i32) {
    %c0_i32 = arith.constant 0 : i32
    %c0_i32_0 = arith.constant 0 : i32
    %c0_i32_1 = arith.constant 0 : i32
    return %arg0, %c0_i32, %c0_i32_0 : i32, i32, i32
  }
  func.func @transform_1(%arg0: i32) -> (i32, i32) {
    %c0_i32 = arith.constant 0 : i32
    %c0_i32_0 = arith.constant 0 : i32
    %c0_i32_1 = arith.constant 0 : i32
    return %c0_i32, %c0_i32_0 : i32, i32
  }
  func.func @transform_2(%arg0: i32) -> (i32, i32) {
    %c0_i32 = arith.constant 0 : i32
    %c0_i32_0 = arith.constant 0 : i32
    %c0_i32_1 = arith.constant 0 : i32
    return %c0_i32, %c0_i32_0 : i32, i32
  }
  func.func @transform_3(%arg0: i32) -> (i32, i32, i32) {
    %c0_i32 = arith.constant 0 : i32
    %c0_i32_0 = arith.constant 0 : i32
    %c0_i32_1 = arith.constant 0 : i32
    %c0_i32_2 = arith.constant 0 : i32
    return %c0_i32, %c0_i32_0, %c0_i32_1 : i32, i32, i32
  }
  func.func @transform_4(%arg0: i32) -> (i32, i32) {
    %c0_i32 = arith.constant 0 : i32
    %c0_i32_0 = arith.constant 0 : i32
    %c0_i32_1 = arith.constant 0 : i32
    return %c0_i32, %c0_i32_0 : i32, i32
  }
  func.func @transform_5(%arg0: i32) -> (i32, i32) {
    %c0_i32 = arith.constant 0 : i32
    %c0_i32_0 = arith.constant 0 : i32
    %c0_i32_1 = arith.constant 0 : i32
    return %c0_i32, %c0_i32_0 : i32, i32
  }
  func.func @transform_6(%arg0: i32) -> (i32, i32, i32) {
    %c0_i32 = arith.constant 0 : i32
    %c0_i32_0 = arith.constant 0 : i32
    %c0_i32_1 = arith.constant 0 : i32
    %c0_i32_2 = arith.constant 0 : i32
    return %c0_i32, %c0_i32_0, %c0_i32_1 : i32, i32, i32
  }
  func.func @transform_7(%arg0: i32) -> (i32, i32, i32) {
    %c0_i32 = arith.constant 0 : i32
    %c0_i32_0 = arith.constant 0 : i32
    %c0_i32_1 = arith.constant 0 : i32
    return %arg0, %c0_i32, %c0_i32_0 : i32, i32, i32
  }
}

</mosaic_0001>

<bundles_post_ra>
// kernel: tpu_custom_call.1
= control target key start
LH: loop header
LB: loop body
LE: loop exit
PB: predicated region body
PF: predicated region fallthrough
CT: control target
= control target key end

     0   :  { %12 = vsyncpa [#allocation3], 0  ;;  %s8527_s0 = inlined_call_operand.vmem [shape: f32[2,16,256], index: 0, kind: input, shape index: {}]   ;;  %s8528_s1 = inlined_call_operand.vmem [shape: f32[4,16], index: 1, kind: input, shape index: {}]   ;;  %s8529_s2 = inlined_call_operand.vmem [shape: f32[4,16], index: 2, kind: input, shape index: {}]   ;;  %s8530_s3 = inlined_call_operand.vmem [shape: f32[9,16,4], index: 3, kind: input, shape index: {}]   ;;  %s8531_s4 = inlined_call_operand.vmem [shape: f32[16,1], index: 4, kind: input, shape index: {}]   ;;  %s8532_s5 = inlined_call_operand.vmem [shape: f32[16,4], index: 5, kind: input, shape index: {}]   ;;  %s8533_s6 = inlined_call_operand.vmem [shape: f32[9,1,256], index: 6, kind: input, shape index: {}]   ;;  %s8534_s7 = inlined_call_operand.hbm [shape: f32[2,16,256], index: 7, kind: output, shape index: {}]  }
   0x1   :  { %14 = vsyncpa [#allocation3 + $0x1], 0  ;;  %s7500_s24 = smov 0   ;;  %s7502_s25 = smov 0  }
   0x2   :  { %s7504_s26 = smov 0   ;;  %s7506_s27 = smov 0  }
   0x3 LB: > { %s7521_s28 = sadd.s32 4294967295, %s7440_s27   ;;  %s6975_s29 = sadd.s32 4294967294, %s7440_s27   ;;  %s7440_s27 = sphi %s7506_s27, %s8540_s27   ;;  %s7436_s26 = sphi %s7504_s26, %s8539_s26   ;;  %s7432_s25 = sphi %s7502_s25, %s8538_s25   ;;  %s7428_s24 = sphi %s7500_s24, %s8537_s24  }
   0x4   : > { %s7525_s30 = sadd.s32 1, %s7440_s27   ;;  %s179_s8 = sadd.s32 1, %s7436_s26 }
   0x5   : > { %s176_s9 = ssub.s32 %s7440_s27, %s7525_s30  ;;  %p189_p0 = scmp.ne.s32.totalorder %s7436_s26, %s7432_s25 }
   0x6   : > { %p177_p1 = scmp.eq.s32.totalorder %s176_s9, 0  ;;  %p190_p2 = scmp.eq.s32.totalorder %s7521_s28, 1 }
   0x7   : > { %p195_p3 = scmp.ne.s32.totalorder %s7432_s25, %s7428_s24  ;;  %p196_p4 = scmp.eq.s32.totalorder %s6975_s29, 1 }
   0x8   : > { %s7536_s10 = scalar_select %p177_p1, %s7436_s26, %s179_s8  }
   0x9   : > { %p7538_p5 = por %p190_p2, %p189_p0  ;;  %p7542_p6 = por %p196_p4, %p195_p3 }
   0xa   : > { %p6978_p7 = scmp.ge.s32.totalorder %s7440_s27, 1  ;;  %p240_p8 = scmp.lt.s32.totalorder %s7440_s27, 3 }
   0xc   : > { %p241_p9 = pnand %p6978_p7, %p240_p8 }
   0xd   : > { %p272_p10 = scmp.lt.s32.totalorder (!%p241_p9), %s7521_s28, 1  ;;  %v281_v0 = vld [vmem:[%s8528_s1] sm:$0xf] (!%p241_p9)  ;;  %vm282_vm0 = vcmask (!%p241_p9), 130048   ;;  %v7442_v1 = vmov (!%p241_p9), 0.0   ;;  %v1287_v40 = vlaneseq (!%p241_p9)  ;;  %s7443_s22 = smov (!%p241_p9), 18  }
   0xe   : > { %244 = sbr.rel (%p241_p9) target bundleno = 1287 (0x507), region = 48  ;;  %354 = vmatprep.mubr.f32.mxu0 (!%p241_p9), %v7442_v1  ;;  %v284_v2 = vsel (!%p241_p9), %vm282_vm0, %v281_v0, 0  ;;  %849 = vmatprep.mubr.f32.mxu1 (!%p241_p9), %v7442_v1  ;;  %v6992_v43 = vld [vmem:[%s8533_s6 + $0xa] sm:$0x3] (!%p241_p9)  ;;  %s7444_s23 = smov (!%p241_p9), 17   ;;  %vm1278_vm1 = vcmask (!%p241_p9), 138240  }
   0xf   : > { %v7556_v3 = vand.u32 (!%p241_p9), 4294901760, %v284_v2  ;;  %v1288_v41 = vshrl.u32 (!%p241_p9), %v1287_v40, 7  ;;  %v777_v49 = vld [vmem:[%s8529_s2] sm:$0xf] (!%p241_p9)  ;;  %s7445_s9 = smov (!%p241_p9), 111   ;;  %vm4053_vm2 = vcmask (!%p241_p9), 146432  }
  0x10   : > { %v779_v50 = vsel (!%p241_p9), %vm282_vm0, %v777_v49, 0  ;;  %v6995_v61 = vld [vmem:[%s8533_s6 + $0xc] sm:$0x3] (!%p241_p9)  ;;  %v6984_v0 = vld [vmem:[%s8533_s6 + $0x4] sm:$0x3] (!%p241_p9)  ;;  %s7447_s18 = smov (!%p241_p9), 32  }
  0x11   : > { %v356_v4 = vsub.f32 (!%p241_p9), %v284_v2, %v7556_v3  ;;  %v7583_v42 = vsub.s32 (!%p241_p9), 0, %v1288_v41  ;;  %v7589_v45 = vsub.s32 (!%p241_p9), 1, %v1288_v41  ;;  %v850_v51 = vand.u32 (!%p241_p9), 4294901760, %v779_v50  ;;  %s7449_s20 = smov (!%p241_p9), 110   ;;  %s7452_s21 = smov (!%p241_p9), 126  }
  0x12   : > { %vm1315_vm3 = vcmask (!%p241_p9), 31744   ;;  %vm3507_vm4 = vcmask (!%p241_p9), 908288   ;;  %vm1322_vm5 = vcmask (!%p241_p9), 1043456   ;;  %vm1312_vm6 = vcmask (!%p241_p9), 1039360   ;;  %s7454_s29 = smov (!%p241_p9), 95   ;;  %s7455_s17 = smov (!%p241_p9), 112  }
  0x13   : > { %v357_v8 = vand.u32 (!%p241_p9), 4294901760, %v356_v4  ;;  %v4044_v44 = vrot.slane (!%p241_p9), %v6992_v43, %v7583_v42  ;;  %v4048_v46 = vrot.slane (!%p241_p9), %v6992_v43, %v7589_v45  ;;  %v851_v52 = vsub.f32 (!%p241_p9), %v779_v50, %v850_v51  ;;  %s7009_s14 = sshll.u32 (!%p241_p9), %s7521_s28, 9 }
  0x14   : > { %v4610_v63 = vrot.slane (!%p241_p9), %v6995_v61, %v7583_v42  ;;  %vm4619_vm7 = vcmask (!%p241_p9), 261120   ;;  %vm2382_vm8 = vcmask (!%p241_p9), 15360   ;;  %vm4073_vm9 = vcmask (!%p241_p9), 900096  }
  0x15   : > { %s273_s15 = scalar_select %p272_p10, %s7521_s28, 1  ;;  %v358_v14 = vsub.f32 %v356_v4, %v357_v8  ;;  %4049 = vrot.lane.b32.xlu1 %v4044_v44, %s7443_s22  ;;  %v852_v53 = vand.u32 4294901760, %v851_v52  ;;  %vm4639_vm10 = vcmask 785408   ;;  %vm2402_vm11 = vcmask 1031168  }
  0x16   : > { %vm5725_vm12 = vcmask 277504   ;;  %vm5179_vm13 = vcmask 777216   ;;  %vm2967_vm14 = vcmask 916480   ;;  %vm5745_vm15 = vcmask 769024  }
  0x17   : > { %s7008_s16 = sshll.u32 %s273_s15, 5  ;;  %v359_v21 = vand.u32 4294901760, %v358_v14  ;;  %v853_v54 = vsub.f32 %v851_v52, %v852_v53  ;;  %s7446_s15 = smov 127  }
  0x18   : > { %s276_s19 = scalar_lea.vmem %s8527_s0, %s7008_s16 }
  0x19   : > { %v278_v5 = vld [vmem:[%s276_s19 + $0x8] sm:$0xff]  ;;  %v280_v6 = vld [vmem:[%s276_s19 + $0x18] sm:$0xff]  ;;  %v277_v7 = vld [vmem:[%s276_s19] sm:$0xff]  ;;  %4051 = vrot.lane.b32.xlu1 %v4048_v46, %s7443_s22  ;;  %v854_v55 = vand.u32 4294901760, %v853_v54  ;;  %s7453_s22 = smov 34  }
  0x1a   : > { %v286_v9 = vand.u32 4294901760, %v278_v5  ;;  %v290_v10 = vand.u32 4294901760, %v280_v6  ;;  %v279_v11 = vld [vmem:[%s276_s19 + $0x10] sm:$0xff]  ;;  %v288_v12 = vand.u32 4294901760, %v277_v7  ;;  %s7448_s19 = smov 2  }
  0x1b   : > { %v292_v13 = vand.u32 4294901760, %v279_v11 }
  0x1c   : > { %v7562_v15 = vpack.c.bf16 %v290_v10, %v286_v9  ;;  %v367_v16 = vsub.f32 %v278_v5, %v286_v9  ;;  %v379_v17 = vsub.f32 %v280_v6, %v290_v10  ;;  %v373_v18 = vsub.f32 %v277_v7, %v288_v12 }
  0x1d   : > { %v7564_v19 = vpack.c.bf16 %v292_v13, %v288_v12  ;;  %v385_v20 = vsub.f32 %v279_v11, %v292_v13  ;;  %v2377_v6 = vrot.slane %v6984_v0, %v7589_v45  ;;  %v6990_v13 = vld [vmem:[%s8530_s3 + $0x40] sm:$0xff] }
  0x1e   : > { %7011 = vmatprep.subr.bf16.mxu0 %v7562_v15  ;;  %v368_v22 = vand.u32 4294901760, %v367_v16  ;;  %v380_v23 = vand.u32 4294901760, %v379_v17  ;;  %v374_v24 = vand.u32 4294901760, %v373_v18  ;;  %7035 = vmatprep.subr.bf16.mxu1 %v7562_v15  ;;  %v7018_v35 = vpack.c.bf16 %v379_v17, %v367_v16 }
  0x1f   : > { %7013 = vmatpush1.bf16.msra.mxu0 %v7564_v19  ;;  %v386_v25 = vand.u32 4294901760, %v385_v20  ;;  %7037 = vmatpush1.bf16.msra.mxu1 %v7564_v19  ;;  %v7020_v37 = vpack.c.bf16 %v385_v20, %v373_v18  ;;  %v3511_v14 = vsel %vm1315_vm3, %v6990_v13, 0 }
  0x20   : > { %v369_v26 = vsub.f32 %v367_v16, %v368_v22  ;;  %v381_v27 = vsub.f32 %v379_v17, %v380_v23  ;;  %v375_v28 = vsub.f32 %v373_v18, %v374_v24  ;;  %v7026_v38 = vpack.c.bf16 %v380_v23, %v368_v22  ;;  %v6982_v18 = vld [vmem:[%s8530_s3 + $0x10] sm:$0xff]  ;;  %v6983_v22 = vld [vmem:[%s8530_s3 + $0x18] sm:$0xff] }
  0x21   : > { %v387_v29 = vsub.f32 %v385_v20, %v386_v25  ;;  %v7028_v39 = vpack.c.bf16 %v386_v25, %v374_v24  ;;  %v7645_v16 = vand.u32 4294901760, %v3511_v14 }
  0x22   : > { %360 = vmatmul.mubr.f32.vlgmr.msra.gmra.mrb[0].mxu0 %v359_v21  ;;  %v370_v30 = vand.u32 4294901760, %v369_v26  ;;  %v382_v31 = vand.u32 4294901760, %v381_v27  ;;  %v376_v32 = vand.u32 4294901760, %v375_v28  ;;  %855 = vmatmul.mubr.f32.vlgmr.msra.gmra.mrb[0].mxu1 %v854_v55  ;;  %v1317_v21 = vsel %vm1315_vm3, %v6982_v18, 0 }
  0x23   : > { %v388_v33 = vand.u32 4294901760, %v387_v29  ;;  %450 = vmatprep.mubr.f32.mxu0 %v7442_v1  ;;  %945 = vmatprep.mubr.f32.mxu1 %v7442_v1  ;;  %v7654_v20 = vsub.f32 %v3511_v14, %v7645_v16  ;;  %v7663_v24 = vand.u32 4294901760, %v1317_v21  ;;  %v1320_v27 = vsel %vm1315_vm3, %v6983_v22, 0 }
  0x24   : > { %v7014_v34 = vpack.c.bf16 %v382_v31, %v370_v30  ;;  %v7674_v31 = vand.u32 4294901760, %v1320_v27 }
  0x25   : > { %v7016_v36 = vpack.c.bf16 %v388_v33, %v376_v32  ;;  %v3589_v25 = vand.u32 4294901760, %v7654_v20  ;;  %v7669_v29 = vsub.f32 %v1317_v21, %v7663_v24 }
  0x26   : > { %7015 = vmatprep.subr.bf16.mxu0 %v7014_v34  ;;  %7039 = vmatprep.subr.bf16.mxu1 %v7014_v34  ;;  %v7687_v44 = vsub.f32 %v1320_v27, %v7674_v31 }
  0x27   : > { %7017 = vmatpush1.bf16.msra.mxu0 %v7016_v36  ;;  %7041 = vmatpush1.bf16.msra.mxu1 %v7016_v36  ;;  %v3590_v30 = vsub.f32 %v7654_v20, %v3589_v25 }
  0x28   : > { %7019 = vmatprep.subr.bf16.mxu0 %v7018_v35  ;;  %7043 = vmatprep.subr.bf16.mxu1 %v7018_v35 }
  0x29   : > { %v3591_v43 = vand.u32 4294901760, %v3590_v30 }
  0x2a   : > { %452 = vmatmul.mubr.f32.vlgmr.msra.gmra.mrb[0].mxu0 %v7556_v3  ;;  %947 = vmatmul.mubr.f32.vlgmr.msra.gmra.mrb[0].mxu1 %v850_v51 }
  0x2b   : > { %7021 = vmatpush1.bf16.msra.mxu0 %v7020_v37  ;;  %530 = vmatprep.mubr.f32.mxu0 %v7442_v1 }
  0x2c   : > { %7023 = vmatprep.subr.bf16.mxu0 %v7562_v15  ;;  %7045 = vmatpush1.bf16.msra.mxu1 %v7020_v37 }
  0x2d   : > { %1025 = vmatprep.mubr.f32.mxu1 %v7442_v1  ;;  %7047 = vmatprep.subr.bf16.mxu1 %v7562_v15 }
  0x32   : > { %533 = vmatmul.mubr.f32.vlgmr.msra.gmra.mrb[0].mxu0 %v356_v4  ;;  %1028 = vmatmul.mubr.f32.vlgmr.msra.gmra.mrb[0].mxu1 %v851_v52  ;;  %v2373_v4 = vrot.slane %v6984_v0, %v7583_v42 }
  0x33   : > { %7025 = vmatpush1.bf16.msra.mxu0 %v7564_v19  ;;  %607 = vmatprep.mubr.f32.mxu0 %v7442_v1 }
  0x34   : > { %7027 = vmatprep.subr.bf16.mxu0 %v7026_v38  ;;  %7049 = vmatpush1.bf16.msra.mxu1 %v7564_v19 }
  0x35   : > { %1102 = vmatprep.mubr.f32.mxu1 %v7442_v1  ;;  %7051 = vmatprep.subr.bf16.mxu1 %v7026_v38 }
  0x3a   : > { %611 = vmatmul.mubr.f32.vlgmr.msra.gmra.mrb[0].mxu0 %v357_v8  ;;  %1106 = vmatmul.mubr.f32.vlgmr.msra.gmra.mrb[0].mxu1 %v852_v53  ;;  %v6987_v8 = vld [vmem:[%s8533_s6 + $0x6] sm:$0x3] }
  0x3b   : > { %7029 = vmatpush1.bf16.msra.mxu0 %v7028_v39  ;;  %693 = vmatprep.mubr.f32.mxu0 %v7442_v1  ;;  %v2939_v11 = vrot.slane %v6987_v8, %v7583_v42  ;;  %v2943_v12 = vrot.slane %v6987_v8, %v7589_v45 }
  0x3c   : > { %7031 = vmatprep.subr.bf16.mxu0 %v7562_v15  ;;  %7053 = vmatpush1.bf16.msra.mxu1 %v7028_v39  ;;  %v1396_v39 = vand.u32 4294901760, %v7669_v29 }
  0x3d   : > { %1188 = vmatprep.mubr.f32.mxu1 %v7442_v1  ;;  %7055 = vmatprep.subr.bf16.mxu1 %v7562_v15  ;;  %v6991_v15 = vld [vmem:[%s8530_s3 + $0x48] sm:$0xff] }
  0x3e   : > { %v3514_v17 = vsel %vm1315_vm3, %v6991_v15, 0  ;;  %v1397_v53 = vsub.f32 %v7669_v29, %v1396_v39 }
  0x42   : > { %695 = vmatmul.mubr.f32.vlgmr.msra.gmra.mrb[0].mxu0 %v7556_v3  ;;  %1190 = vmatmul.mubr.f32.vlgmr.msra.gmra.mrb[0].mxu1 %v850_v51 }
  0x43   : > { %7033 = vmatpush1.bf16.msra.mxu0 %v7564_v19  ;;  %769 = vmatprep.mubr.f32.mxu0 %v7442_v1 }
  0x44   : > { %7057 = vmatpush1.bf16.msra.mxu1 %v7564_v19  ;;  %1264 = vmatprep.mubr.f32.mxu1 %v7442_v1  ;;  %v7651_v19 = vand.u32 4294901760, %v3514_v17 }
  0x46   : > { %v7661_v23 = vsub.f32 %v3514_v17, %v7651_v19 }
  0x48   : > { %v3600_v28 = vand.u32 4294901760, %v7661_v23 }
  0x4a   : > { %771 = vmatmul.mubr.f32.vlgmr.msra.gmra.mrb[0].mxu0 %v7556_v3  ;;  %1266 = vmatmul.mubr.f32.vlgmr.msra.gmra.mrb[0].mxu1 %v850_v51  ;;  %v4614_v3 = vrot.slane %v6995_v61, %v7589_v45  ;;  %v3601_v38 = vsub.f32 %v7661_v23, %v3600_v28 }
  0x4b   : > { %3586 = vmatprep.mubr.f32.mxu0 %v7442_v1  ;;  %1393 = vmatprep.mubr.f32.mxu1 %v7442_v1 }
  0x4c   : > { %v3602_v52 = vand.u32 4294901760, %v3601_v38 }
  0x87   : > { %v4050_v62 = vpop.permute.xlu1 %4049 }
  0x8b   : > { %v4052_v2 = vpop.permute.xlu1 %4051 }
  0x8c   : > { %v4054_v5 = vsel %vm4053_vm2, %v4050_v62, %v4052_v2 }
 0x11d   : > { %v772_v47 = vpop.f32.mrb[0].mxu0 }
 0x11e   : > { %1274 = vrot.lane.b32.xlu0 %v772_v47, %s7444_s23  ;;  %v774_v48 = vpop.f32.mrb[1].mxu0 }
 0x122   : > { %1276 = vrot.lane.b32.xlu0 %v774_v48, %s7444_s23  ;;  %s7450_s23 = smov 16  }
 0x190   : > { %v1275_v56 = vpop.permute.xlu0 %1274 }
 0x191   : > { %v7606_v57 = vsel %vm1278_vm1, 0.0, %v1275_v56 }
 0x192   : > { %3501 = vrot.lane.b32.xlu0 %v7606_v57, %s7445_s9  ;;  %v4058_v10 = vmul.f32 %v4050_v62, %v7606_v57 }
 0x194   : > { %v1277_v58 = vpop.permute.xlu0 %1276 }
 0x195   : > { %v7609_v59 = vsel %vm1278_vm1, %v1275_v56, %v1277_v58  ;;  %v7611_v60 = vsel %vm1278_vm1, %v1277_v58, 0.0  ;;  %v1407_v58 = vand.u32 4294901760, %v7687_v44 }
 0x196   : > { %3505 = vrot.lane.b32.xlu1 %v7611_v60, %s7445_s9  ;;  %3503 = vrot.lane.b32.xlu0 %v7609_v59, %s7445_s9  ;;  %v4059_v7 = vmul.f32 %v4054_v5, %v7609_v59  ;;  %v4060_v9 = vmul.f32 %v4052_v2, %v7611_v60  ;;  %v1398_v5 = vand.u32 4294901760, %v1397_v53  ;;  %s269_s9 = sand.u32 1, %s7432_s25  }
 0x197   : > { %s6979_s13 = sshll.u32 %s269_s9, 5 }
 0x19a   : > { %1308 = vrot.lane.b32.xlu1 %v7609_v59, %s7446_s15  ;;  %1310 = vrot.lane.b32.xlu0 %v7611_v60, %s7446_s15 }
 0x19e   : > { %1306 = vrot.lane.b32.xlu1 %v7606_v57, %s7446_s15  ;;  %4615 = vrot.lane.b32.xlu0 %v4610_v63, %s7447_s18  ;;  %s271_s15 = scalar_lea.vmem [#allocation2], %s6979_s13 }
 0x19f   : > { %s6913_s16 = sshll.u32 %s271_s15, 4  ;;  %s8483_s16 = int_to_ptr.vmem [resolvable:$true] %s6913_s16 }
 0x1a2   : > { %4617 = vrot.lane.b32.xlu1 %v4614_v3, %s7447_s18  ;;  %2378 = vrot.lane.b32.xlu0 %v2373_v4, %s7448_s19  ;;  %s7451_s18 = smov 96  }
 0x1a6   : > { %2380 = vrot.lane.b32.xlu1 %v2377_v6, %s7448_s19  ;;  %4069 = vrot.lane.b32.xlu0 %v4059_v7, %s7449_s20  ;;  %s8485_s19 = scalar_lea.sflag [#allocation3], %s269_s9 }
 0x1aa   : > { %4071 = vrot.lane.b32.xlu1 %v4060_v9, %s7449_s20  ;;  %4067 = vrot.lane.b32.xlu0 %v4058_v10, %s7449_s20  ;;  %v1408_v10 = vsub.f32 %v7687_v44, %v1407_v58  ;;  %s7378_s20 = scalar_lea.vmem %s8483_s16, 512 }
 0x1ab   : > { %p7379_p11 = scmp.ne.s32.totalorder %s8483_s16, %s7378_s20 }
 0x1ad   : > { %p7380_p12 = pnand %p7379_p11, %p7538_p5 }
 0x1ae   : > { %2944 = vrot.lane.b32.xlu1 %v2939_v11, %s7450_s23  ;;  %2946 = vrot.lane.b32.xlu0 %v2943_v12, %s7450_s23 }
 0x1af   : > { %p7381_p13 = pneg %p7380_p12 }
 0x204   : > { %v3502_v26 = vpop.permute.xlu0 %3501 }
 0x208   : > { %v3506_v32 = vpop.permute.xlu1 %3505  ;;  %v3504_v33 = vpop.permute.xlu0 %3503 }
 0x209   : > { %v3508_v34 = vsel %vm3507_vm4, %v3502_v26, %v3504_v33  ;;  %v3509_v35 = vsel %vm3507_vm4, %v3504_v33, %v3506_v32  ;;  %v1409_v26 = vand.u32 4294901760, %v1408_v10 }
 0x20a   : > { %v3516_v36 = vsel %vm1322_vm5, %v3508_v34, 0  ;;  %v3518_v37 = vsel %vm1322_vm5, %v3509_v35, 0 }
 0x20b   : > { %v7682_v40 = vand.u32 4294901760, %v3518_v37  ;;  %v7684_v41 = vand.u32 4294901760, %v3516_v36 }
 0x20c   : > { %v1309_v46 = vpop.permute.xlu1 %1308  ;;  %v1311_v47 = vpop.permute.xlu0 %1310 }
 0x20d   : > { %v7690_v48 = vsub.f32 %v3518_v37, %v7682_v40  ;;  %v7693_v49 = vsub.f32 %v3516_v36, %v7684_v41  ;;  %v1314_v50 = vsel %vm1312_vm6, %v1309_v46, %v1311_v47  ;;  %3521 = vmatprep.subr.mxu0 %v7682_v40  ;;  %v7000_v37 = vld [vmem:[%s8533_s6 + $0x10] sm:$0x3] }
 0x20e   : > { %v1325_v51 = vsel %vm1322_vm5, %v1314_v50, 0  ;;  %3523 = vmatpush1.msra.mxu0 %v7684_v41 }
 0x20f   : > { %v3617_v54 = vand.u32 4294901760, %v7693_v49  ;;  %v7703_v55 = vand.u32 4294901760, %v1325_v51  ;;  %3592 = vmatmul.mubr.f32.vlgmr.msra.gmra.mrb[2].mxu0 %v3591_v43  ;;  %v3611_v56 = vand.u32 4294901760, %v7690_v48  ;;  %v5716_v43 = vrot.slane %v7000_v37, %v7583_v42 }
 0x210   : > { %v1307_v61 = vpop.permute.xlu1 %1306  ;;  %v4616_v62 = vpop.permute.xlu0 %4615  ;;  %3597 = vmatprep.mubr.f32.mxu0 %v7442_v1 }
 0x211   : > { %v7709_v63 = vsub.f32 %v1325_v51, %v7703_v55  ;;  %v1313_v0 = vsel %vm1312_vm6, %v1307_v61, %v1309_v46  ;;  %v4624_v2 = vmul.f32 %v4616_v62, %v7606_v57  ;;  %1328 = vmatprep.subr.mxu1 %v7703_v55  ;;  %v3612_v3 = vsub.f32 %v7690_v48, %v3611_v56 }
 0x212   : > { %v1323_v4 = vsel %vm1322_vm5, %v1313_v0, 0  ;;  %v3618_v6 = vsub.f32 %v7693_v49, %v3617_v54  ;;  %v5720_v51 = vrot.slane %v7000_v37, %v7589_v45  ;;  %v6993_v0 = vld [vmem:[%s8530_s3 + $0x50] sm:$0xff] }
 0x213   : > { %v7721_v7 = vand.u32 4294901760, %v1323_v4  ;;  %3603 = vmatmul.mubr.f32.gmra.mrb[4].mxu0 %v3602_v52  ;;  %4633 = vrot.lane.b32.xlu1 %v4624_v2, %s7451_s18  ;;  %v3613_v8 = vand.u32 4294901760, %v3612_v3  ;;  %v1418_v9 = vand.u32 4294901760, %v7709_v63 }
 0x214   : > { %v4618_v11 = vpop.permute.xlu1 %4617  ;;  %v3619_v12 = vand.u32 4294901760, %v3618_v6  ;;  %3683 = vmatprep.mubr.f32.mxu0 %v7442_v1  ;;  %v2379_v18 = vpop.permute.xlu0 %2378 }
 0x215   : > { %v7729_v13 = vsub.f32 %v1323_v4, %v7721_v7  ;;  %v4620_v14 = vsel %vm4619_vm7, %v4616_v62, %v4618_v11  ;;  %v4626_v15 = vmul.f32 %v4618_v11, %v7611_v60  ;;  %1330 = vmatpush1.msra.mxu1 %v7721_v7  ;;  %3614 = vmatprep.subr.mxu0 %v3613_v8  ;;  %v4077_v4 = vsel %vm1315_vm3, %v6993_v0, 0 }
 0x216   : > { %v4625_v17 = vmul.f32 %v4620_v14, %v7609_v59  ;;  %1399 = vmatmul.mubr.f32.vlgmr.msra.gmra.mrb[2].mxu1 %v1398_v5  ;;  %v1419_v21 = vsub.f32 %v7709_v63, %v1418_v9  ;;  %3620 = vmatpush1.msra.mxu0 %v3619_v12  ;;  %v2387_v46 = vmul.f32 %v2379_v18, %v7606_v57 }
 0x217   : > { %v1424_v22 = vand.u32 4294901760, %v7729_v13  ;;  %4637 = vrot.lane.b32.xlu0 %v4626_v15, %s7451_s18  ;;  %3685 = vmatmul.mubr.f32.vlgmr.msra.gmra.mrb[2].mxu0 %v7645_v16  ;;  %v1300_v15 = vld [vmem:[%s8530_s3 + $0x8] sm:$0xff] }
 0x218   : > { %3700 = vmatprep.subr.mxu0 %v7690_v48  ;;  %v2381_v27 = vpop.permute.xlu1 %2380  ;;  %v1420_v30 = vand.u32 4294901760, %v1419_v21  ;;  %4635 = vrot.lane.b32.xlu1 %v4625_v17, %s7451_s18  ;;  %v4070_v38 = vpop.permute.xlu0 %4069  ;;  %v1285_v48 = vld [vmem:[%s8533_s6] sm:$0x3]  ;;  %v1845_v21 = vsel %vm1315_vm3, %v1300_v15, 0  ;;  %s8481_s18 = scalar_lea.hbm %s8534_s7, %s7009_s14 }
 0x219   : > { %v2383_v32 = vsel %vm2382_vm8, %v2379_v18, %v2381_v27  ;;  %v2389_v33 = vmul.f32 %v2381_v27, %v7611_v60  ;;  %3703 = vmatpush1.msra.mxu0 %v7693_v49  ;;  %v1425_v34 = vsub.f32 %v7729_v13, %v1424_v22  ;;  %1404 = vmatprep.mubr.f32.mxu1 %v7442_v1 }
 0x21a   : > { %v2388_v35 = vmul.f32 %v2383_v32, %v7609_v59  ;;  %1421 = vmatprep.subr.mxu1 %v1420_v30  ;;  %3784 = vmatprep.subr.mxu0 %v7682_v40  ;;  %v1294_v53 = vrot.slane %v1285_v48, %v7589_v45  ;;  %v7879_v32 = vand.u32 4294901760, %v1845_v21 }
 0x21b   : > { %1410 = vmatmul.mubr.f32.gmra.mrb[4].mxu1 %v1409_v26  ;;  %v1426_v36 = vand.u32 4294901760, %v1425_v34  ;;  %3690 = vmatprep.mubr.f32.mxu0 %v7442_v1 }
 0x21c   : > { %2398 = vrot.lane.b32.xlu0 %v2388_v35, %s7452_s21  ;;  %3692 = vmatmul.mubr.f32.gmra.mrb[4].mxu0 %v7651_v19  ;;  %v4072_v47 = vpop.permute.xlu1 %4071  ;;  %v4068_v50 = vpop.permute.xlu0 %4067  ;;  %v1298_v3 = vmul.f32 %v1294_v53, %v7609_v59 }
 0x21d   : > { %2400 = vrot.lane.b32.xlu1 %v2389_v33, %s7452_s21  ;;  %1427 = vmatpush1.msra.mxu1 %v1426_v36  ;;  %v4075_v52 = vsel %vm4073_vm9, %v4070_v38, %v4072_v47 }
 0x21e   : > { %1490 = vmatprep.mubr.f32.mxu1 %v7442_v1  ;;  %1507 = vmatprep.subr.mxu1 %v7709_v63  ;;  %v7810_v63 = vand.u32 4294901760, %v4077_v4  ;;  %v1851_v8 = vsel %vm1322_vm5, %v1298_v3, 0  ;;  %v6997_v3 = vld [vmem:[%s8530_s3 + $0x68] sm:$0xff] }
 0x21f   : > { %1492 = vmatmul.mubr.f32.vlgmr.msra.gmra.mrb[2].mxu1 %v7663_v24  ;;  %3766 = vmatprep.mubr.f32.mxu0 %v7442_v1 }
 0x220   : > { %1510 = vmatpush1.msra.mxu1 %v7729_v13  ;;  %3769 = vmatmul.mubr.f32.vlgmr.msra.gmra.mrb[2].mxu0 %v7654_v20  ;;  %v2945_v61 = vpop.permute.xlu1 %2944  ;;  %v2947_v62 = vpop.permute.xlu0 %2946  ;;  %v4074_v20 = vsel %vm4073_vm9, %v4068_v50, %v4070_v38  ;;  %v7832_v11 = vsub.f32 %v4077_v4, %v7810_v63  ;;  %v7903_v38 = vsub.f32 %v1845_v21, %v7879_v32 }
 0x221   : > { %1591 = vmatprep.subr.mxu1 %v7703_v55  ;;  %3786 = vmatpush1.msra.mxu0 %v7684_v41  ;;  %v2948_v45 = vsel %vm282_vm0, %v2945_v61, %v2947_v62  ;;  %v2954_v49 = vmul.f32 %v2947_v62, %v7611_v60  ;;  %v4082_v6 = vsel %vm1322_vm5, %v4074_v20, 0  ;;  %v2952_v12 = vmul.f32 %v2945_v61, %v7606_v57 }
 0x222   : > { %5721 = vrot.lane.b32.xlu1 %v5716_v43, %s7453_s22  ;;  %3871 = vmatprep.subr.mxu0 %v3611_v56  ;;  %v4084_v56 = vsel %vm1322_vm5, %v4075_v52, 0  ;;  %v4646_v20 = vsel %vm1315_vm3, %v6997_v3, 0 }
 0x223   : > { %2396 = vrot.lane.b32.xlu0 %v2387_v46, %s7452_s21  ;;  %1497 = vmatprep.mubr.f32.mxu1 %v7442_v1  ;;  %v7788_v2 = vand.u32 4294901760, %v4084_v56  ;;  %s7458_s21 = smov [#allocation2]  }
 0x224   : > { %3774 = vmatprep.mubr.f32.mxu0 %v7442_v1  ;;  %1499 = vmatmul.mubr.f32.gmra.mrb[4].mxu1 %v7674_v31 }
 0x225   : > { %3777 = vmatmul.mubr.f32.gmra.mrb[4].mxu0 %v7661_v23  ;;  %1573 = vmatprep.mubr.f32.mxu1 %v7442_v1  ;;  %v7813_v5 = vsub.f32 %v4084_v56, %v7788_v2 }
 0x226   : > { %5175 = vrot.lane.b32.xlu1 %v7609_v59, %s7454_s29  ;;  %3849 = vmatprep.mubr.f32.mxu0 %v7442_v1 }
 0x227   : > { %5723 = vrot.lane.b32.xlu0 %v5720_v51, %s7453_s22  ;;  %v4177_v14 = vand.u32 4294901760, %v7813_v5  ;;  %s7382_s22 = sshll.u32 %s7458_s21, 4  ;;  %s7383_s22 = int_to_ptr.vmem [resolvable:$false] %s7382_s22 }
 0x228   : > { %1576 = vmatmul.mubr.f32.vlgmr.msra.gmra.mrb[2].mxu1 %v7669_v29  ;;  %p7385_p0 = scmp.lt.s32.totalorder %s8483_s16, %s7383_s22 }
 0x229   : > { %3853 = vmatmul.mubr.f32.vlgmr.msra.gmra.mrb[2].mxu0 %v3589_v25  ;;  %1593 = vmatpush1.msra.mxu1 %v7721_v7  ;;  %v6994_v25 = vld [vmem:[%s8530_s3 + $0x58] sm:$0xff]  ;;  %v4178_v18 = vsub.f32 %v7813_v5, %v4177_v14 }
 0x22a   : > { %3875 = vmatpush1.msra.mxu0 %v3617_v54  ;;  %1678 = vmatprep.subr.mxu1 %v1418_v9  ;;  %v1290_v54 = vrot.slane %v1285_v48, %v7583_v42  ;;  %v4080_v23 = vsel %vm1315_vm3, %v6994_v25, 0  ;;  %v1299_v42 = vld [vmem:[%s8530_s3] sm:$0xff]  ;;  %v7828_v9 = vand.u32 4294901760, %v1851_v8 }
 0x22b   : > { %3954 = vmatprep.subr.mxu0 %v7682_v40  ;;  %5173 = vrot.lane.b32.xlu1 %v7606_v57, %s7454_s29  ;;  %v2953_v40 = vmul.f32 %v2948_v45, %v7609_v59  ;;  %v7839_v29 = vand.u32 4294901760, %v4080_v23  ;;  %v4179_v33 = vand.u32 4294901760, %v4178_v18  ;;  %v6985_v25 = vld [vmem:[%s8530_s3 + $0x20] sm:$0xff] }
 0x22c   : > { %5177 = vrot.lane.b32.xlu0 %v7611_v60, %s7454_s29  ;;  %1581 = vmatprep.mubr.f32.mxu1 %v7442_v1  ;;  %v1297_v10 = vmul.f32 %v1290_v54, %v7606_v57  ;;  %v2406_v54 = vsel %vm1315_vm3, %v6985_v25, 0  ;;  %s7384_s29 = scalar_lea.vmem %s7383_s22, 1024 }
 0x22d   : > { %3858 = vmatprep.mubr.f32.mxu0 %v7442_v1  ;;  %1584 = vmatmul.mubr.f32.gmra.mrb[4].mxu1 %v7687_v44  ;;  %v4155_v44 = vand.u32 4294901760, %v7832_v11  ;;  %p7386_p1 = scmp.lt.s32.totalorder %s7384_s29, %s7378_s20 }
 0x22e   : > { %3862 = vmatmul.mubr.f32.gmra.mrb[4].mxu0 %v3600_v28  ;;  %1656 = vmatprep.mubr.f32.mxu1 %v7442_v1  ;;  %v7823_v28 = vand.u32 4294901760, %v4082_v6 }
 0x22f   : > { %3938 = vmatprep.mubr.f32.mxu0 %v7442_v1  ;;  %2965 = vrot.lane.b32.xlu1 %v2954_v49, %s7455_s17  ;;  %v4156_v34 = vsub.f32 %v7832_v11, %v4155_v44  ;;  %v8007_v49 = vand.u32 4294901760, %v4646_v20  ;;  %p7387_p2 = por %p7386_p1, %p7385_p0 }
 0x230   : > { %2963 = vrot.lane.b32.xlu0 %v2953_v40, %s7455_s17  ;;  %v7849_v13 = vsub.f32 %v4082_v6, %v7823_v28 }
 0x231   : > { %1660 = vmatmul.mubr.f32.vlgmr.msra.gmra.mrb[2].mxu1 %v1396_v39  ;;  %v1842_v39 = vsel %vm1315_vm3, %v1299_v42, 0  ;;  %v4157_v43 = vand.u32 4294901760, %v4156_v34  ;;  %p7388_p3 = pnand %p7387_p2, %p7381_p13 }
 0x232   : > { %3940 = vmatmul.mubr.f32.vlgmr.msra.gmra.mrb[2].mxu0 %v7645_v16  ;;  %1682 = vmatpush1.msra.mxu1 %v1424_v22  ;;  %v7858_v17 = vand.u32 4294901760, %v1842_v39  ;;  %v4183_v26 = vand.u32 4294901760, %v7849_v13 }
 0x233   : > { %3956 = vmatpush1.msra.mxu0 %v7684_v41  ;;  %1761 = vmatprep.subr.mxu1 %v7703_v55  ;;  %v1848_v41 = vsel %vm1322_vm5, %v1297_v10, 0  ;;  %v7856_v55 = vsub.f32 %v1851_v8, %v7828_v9  ;;  %v8015_v8 = vsub.f32 %v4646_v20, %v8007_v49 }
 0x234   : > { %4087 = vmatprep.subr.mxu0 %v7788_v2  ;;  %2961 = vrot.lane.b32.xlu0 %v2952_v12, %s7455_s17  ;;  %v7871_v22 = vand.u32 4294901760, %v1848_v41  ;;  %v7877_v30 = vsub.f32 %v1842_v39, %v7858_v17  ;;  %s7456_s17 = smov 94  }
 0x235   : > { %1665 = vmatprep.mubr.f32.mxu1 %v7442_v1  ;;  %3945 = vmatprep.mubr.f32.mxu0 %v7442_v1  ;;  %v1944_v27 = vand.u32 4294901760, %v7856_v55  ;;  %v4732_v10 = vand.u32 4294901760, %v8015_v8 }
 0x236   : > { %1669 = vmatmul.mubr.f32.gmra.mrb[4].mxu1 %v1407_v58  ;;  %3947 = vmatmul.mubr.f32.gmra.mrb[4].mxu0 %v7651_v19  ;;  %v7867_v58 = vsub.f32 %v4080_v23, %v7839_v29  ;;  %v7891_v36 = vsub.f32 %v1848_v41, %v7871_v22  ;;  %v1922_v37 = vand.u32 4294901760, %v7877_v30  ;;  %v8017_v23 = vand.u32 4294901760, %v2406_v54 }
 0x237   : > { %1745 = vmatprep.mubr.f32.mxu1 %v7442_v1  ;;  %4019 = vmatprep.mubr.f32.mxu0 %v7442_v1 }
 0x238   : > { %v4166_v35 = vand.u32 4294901760, %v7867_v58  ;;  %v1950_v47 = vand.u32 4294901760, %v7891_v36  ;;  %v1923_v52 = vsub.f32 %v7877_v30, %v1922_v37  ;;  %v8025_v12 = vsub.f32 %v2406_v54, %v8017_v23 }
 0x23a   : > { %1747 = vmatmul.mubr.f32.vlgmr.msra.gmra.mrb[2].mxu1 %v7663_v24  ;;  %4021 = vmatmul.mubr.f32.vlgmr.msra.gmra.mrb[2].mxu0 %v7645_v16  ;;  %v1945_v16 = vsub.f32 %v7856_v55, %v1944_v27  ;;  %v4167_v46 = vsub.f32 %v7867_v58, %v4166_v35  ;;  %v1924_v53 = vand.u32 4294901760, %v1923_v52  ;;  %v2484_v21 = vand.u32 4294901760, %v8025_v12 }
 0x23b   : > { %1763 = vmatpush1.msra.mxu1 %v7721_v7  ;;  %4089 = vmatpush1.msra.mxu0 %v7823_v28  ;;  %v4184_v7 = vsub.f32 %v7849_v13, %v4183_v26 }
 0x23c   : > { %1854 = vmatprep.subr.mxu1 %v7828_v9  ;;  %4180 = vmatprep.subr.mxu0 %v4179_v33  ;;  %v1946_v50 = vand.u32 4294901760, %v1945_v16  ;;  %v4168_v48 = vand.u32 4294901760, %v4167_v46  ;;  %v2485_v16 = vsub.f32 %v8025_v12, %v2484_v21 }
 0x23d   : > { %1752 = vmatprep.mubr.f32.mxu1 %v7442_v1  ;;  %4026 = vmatprep.mubr.f32.mxu0 %v7442_v1  ;;  %v4185_v51 = vand.u32 4294901760, %v4184_v7 }
 0x23e   : > { %1754 = vmatmul.mubr.f32.gmra.mrb[4].mxu1 %v7674_v31  ;;  %4028 = vmatmul.mubr.f32.gmra.mrb[4].mxu0 %v7651_v19  ;;  %v1933_v19 = vand.u32 4294901760, %v7903_v38 }
 0x23f   : > { %1826 = vmatprep.mubr.f32.mxu1 %v7442_v1  ;;  %4152 = vmatprep.mubr.f32.mxu0 %v7442_v1 }
 0x240   : > { %v1934_v56 = vsub.f32 %v7903_v38, %v1933_v19 }
 0x242   : > { %1828 = vmatmul.mubr.f32.vlgmr.msra.gmra.mrb[2].mxu1 %v7663_v24  ;;  %4158 = vmatmul.mubr.f32.vlgmr.msra.gmra.mrb[2].mxu0 %v4157_v43  ;;  %v1951_v24 = vsub.f32 %v7891_v36, %v1950_v47  ;;  %v1935_v62 = vand.u32 4294901760, %v1934_v56 }
 0x243   : > { %1856 = vmatpush1.msra.mxu1 %v7871_v22  ;;  %4186 = vmatpush1.msra.mxu0 %v4185_v51 }
 0x244   : > { %1947 = vmatprep.subr.mxu1 %v1946_v50  ;;  %4266 = vmatprep.subr.mxu0 %v7813_v5  ;;  %v1952_v61 = vand.u32 4294901760, %v1951_v24  ;;  %v6986_v5 = vld [vmem:[%s8530_s3 + $0x28] sm:$0xff] }
 0x245   : > { %1833 = vmatprep.mubr.f32.mxu1 %v7442_v1  ;;  %4163 = vmatprep.mubr.f32.mxu0 %v7442_v1  ;;  %v2409_v42 = vsel %vm1315_vm3, %v6986_v5, 0 }
 0x246   : > { %1835 = vmatmul.mubr.f32.gmra.mrb[4].mxu1 %v7674_v31  ;;  %4169 = vmatmul.mubr.f32.gmra.mrb[4].mxu0 %v4168_v48  ;;  %v7979_v31 = vpop.f32.mrb[0].mxu1  ;;  %v2486_v48 = vand.u32 4294901760, %v2485_v16 }
 0x247   : > { %1919 = vmatprep.mubr.f32.mxu1 %v7442_v1  ;;  %4249 = vmatprep.mubr.f32.mxu0 %v7442_v1  ;;  %v7981_v0 = vpop.f32.mrb[1].mxu1 }
 0x24a   : > { %1925 = vmatmul.mubr.f32.vlgmr.msra.gmra.mrb[2].mxu1 %v1924_v53  ;;  %4251 = vmatmul.mubr.f32.vlgmr.msra.gmra.mrb[2].mxu0 %v7810_v63 }
 0x24b   : > { %1953 = vmatpush1.msra.mxu1 %v1952_v61  ;;  %4269 = vmatpush1.msra.mxu0 %v7849_v13 }
 0x24c   : > { %2033 = vmatprep.subr.mxu1 %v7856_v55  ;;  %4350 = vmatprep.subr.mxu0 %v7788_v2 }
 0x24d   : > { %1930 = vmatprep.mubr.f32.mxu1 %v7442_v1  ;;  %4256 = vmatprep.mubr.f32.mxu0 %v7442_v1 }
 0x24e   : > { %1936 = vmatmul.mubr.f32.gmra.mrb[4].mxu1 %v1935_v62  ;;  %4258 = vmatmul.mubr.f32.gmra.mrb[4].mxu0 %v7839_v29 }
 0x24f   : > { %2016 = vmatprep.mubr.f32.mxu1 %v7442_v1  ;;  %4332 = vmatprep.mubr.f32.mxu0 %v7442_v1 }
 0x252   : > { %2018 = vmatmul.mubr.f32.vlgmr.msra.gmra.mrb[2].mxu1 %v7858_v17  ;;  %4335 = vmatmul.mubr.f32.vlgmr.msra.gmra.mrb[2].mxu0 %v7832_v11 }
 0x253   : > { %2036 = vmatpush1.msra.mxu1 %v7891_v36  ;;  %4352 = vmatpush1.msra.mxu0 %v7823_v28 }
 0x254   : > { %2117 = vmatprep.subr.mxu1 %v7828_v9  ;;  %4437 = vmatprep.subr.mxu0 %v4177_v14  ;;  %v8027_v14 = vand.u32 4294901760, %v2409_v42 }
 0x255   : > { %2023 = vmatprep.mubr.f32.mxu1 %v7442_v1  ;;  %4340 = vmatprep.mubr.f32.mxu0 %v7442_v1 }
 0x256   : > { %2025 = vmatmul.mubr.f32.gmra.mrb[4].mxu1 %v7879_v32  ;;  %4343 = vmatmul.mubr.f32.gmra.mrb[4].mxu0 %v7867_v58 }
 0x257   : > { %2099 = vmatprep.mubr.f32.mxu1 %v7442_v1  ;;  %4415 = vmatprep.mubr.f32.mxu0 %v7442_v1 }
 0x25a   : > { %2102 = vmatmul.mubr.f32.vlgmr.msra.gmra.mrb[2].mxu1 %v7877_v30  ;;  %4419 = vmatmul.mubr.f32.vlgmr.msra.gmra.mrb[2].mxu0 %v4155_v44  ;;  %v4733_v44 = vsub.f32 %v8015_v8, %v4732_v10 }
 0x25b   : > { %2119 = vmatpush1.msra.mxu1 %v7871_v22  ;;  %4441 = vmatpush1.msra.mxu0 %v4183_v26 }
 0x25c   : > { %2204 = vmatprep.subr.mxu1 %v1944_v27  ;;  %4520 = vmatprep.subr.mxu0 %v7788_v2  ;;  %v6996_v2 = vld [vmem:[%s8530_s3 + $0x60] sm:$0xff] }
 0x25d   : > { %2107 = vmatprep.mubr.f32.mxu1 %v7442_v1  ;;  %4424 = vmatprep.mubr.f32.mxu0 %v7442_v1  ;;  %v4643_v45 = vsel %vm1315_vm3, %v6996_v2, 0 }
 0x25e   : > { %2110 = vmatmul.mubr.f32.gmra.mrb[4].mxu1 %v7903_v38  ;;  %4428 = vmatmul.mubr.f32.gmra.mrb[4].mxu0 %v4166_v35  ;;  %v7998_v4 = vand.u32 4294901760, %v4643_v45  ;;  %v4734_v35 = vand.u32 4294901760, %v4733_v44 }
 0x25f   : > { %2182 = vmatprep.mubr.f32.mxu1 %v7442_v1  ;;  %4504 = vmatprep.mubr.f32.mxu0 %v7442_v1 }
 0x260   : > { %v8005_v40 = vsub.f32 %v4643_v45, %v7998_v4 }
 0x262   : > { %2186 = vmatmul.mubr.f32.vlgmr.msra.gmra.mrb[2].mxu1 %v1922_v37  ;;  %4506 = vmatmul.mubr.f32.vlgmr.msra.gmra.mrb[2].mxu0 %v7810_v63  ;;  %v4721_v6 = vand.u32 4294901760, %v8005_v40 }
 0x263   : > { %2208 = vmatpush1.msra.mxu1 %v1950_v47  ;;  %4522 = vmatpush1.msra.mxu0 %v7823_v28 }
 0x264   : > { %2287 = vmatprep.subr.mxu1 %v7828_v9  ;;  %2191 = vmatprep.mubr.f32.mxu1 %v7442_v1  ;;  %v4722_v9 = vsub.f32 %v8005_v40, %v4721_v6 }
 0x265   : > { %4511 = vmatprep.mubr.f32.mxu0 %v7442_v1 }
 0x266   : > { %2195 = vmatmul.mubr.f32.gmra.mrb[4].mxu1 %v1933_v19  ;;  %4513 = vmatmul.mubr.f32.gmra.mrb[4].mxu0 %v7839_v29  ;;  %v4723_v18 = vand.u32 4294901760, %v4722_v9 }
 0x267   : > { %2271 = vmatprep.mubr.f32.mxu1 %v7442_v1  ;;  %4585 = vmatprep.mubr.f32.mxu0 %v7442_v1 }
 0x26a   : > { %2273 = vmatmul.mubr.f32.vlgmr.msra.gmra.mrb[2].mxu1 %v7858_v17  ;;  %4587 = vmatmul.mubr.f32.vlgmr.msra.gmra.mrb[2].mxu0 %v7810_v63 }
 0x26b   : > { %2289 = vmatpush1.msra.mxu1 %v7871_v22  ;;  %2278 = vmatprep.mubr.f32.mxu1 %v7442_v1  ;;  %v8040_v22 = vsub.f32 %v2409_v42, %v8027_v14 }
 0x26c   : > { %4592 = vmatprep.mubr.f32.mxu0 %v7442_v1 }
 0x26d   : > { %v2495_v7 = vand.u32 4294901760, %v8040_v22 }
 0x26e   : > { %2280 = vmatmul.mubr.f32.gmra.mrb[4].mxu1 %v7879_v32  ;;  %4594 = vmatmul.mubr.f32.gmra.mrb[4].mxu0 %v7839_v29 }
 0x26f   : > { %2352 = vmatprep.mubr.f32.mxu1 %v7442_v1  ;;  %4718 = vmatprep.mubr.f32.mxu0 %v7442_v1  ;;  %v2496_v24 = vsub.f32 %v8040_v22, %v2495_v7 }
 0x271   : > { %v2497_v54 = vand.u32 4294901760, %v2496_v24 }
 0x272   : > { %2354 = vmatmul.mubr.f32.vlgmr.msra.gmra.mrb[2].mxu1 %v7858_v17 }
 0x273   : > { %2359 = vmatprep.mubr.f32.mxu1 %v7442_v1 }
 0x276   : > { %2361 = vmatmul.mubr.f32.gmra.mrb[4].mxu1 %v7879_v32 }
 0x277   : > { %2481 = vmatprep.mubr.f32.mxu1 %v7442_v1 }
 0x285   : > { %v4634_v63 = vpop.permute.xlu1 %4633 }
 0x289   : > { %v4638_v28 = vpop.permute.xlu0 %4637 }
 0x28a   : > { %v4636_v11 = vpop.permute.xlu1 %4635 }
 0x28b   : > { %v4640_v29 = vsel %vm4639_vm10, %v4634_v63, %v4636_v11  ;;  %v4641_v39 = vsel %vm4639_vm10, %v4636_v11, %v4638_v28 }
 0x28c   : > { %v4648_v15 = vsel %vm1322_vm5, %v4640_v29, 0  ;;  %v4650_v13 = vsel %vm1322_vm5, %v4641_v39, 0  ;;  %v6998_v29 = vld [vmem:[%s8530_s3 + $0x70] sm:$0xff] }
 0x28d   : > { %v8031_v41 = vand.u32 4294901760, %v4650_v13  ;;  %v8033_v55 = vand.u32 4294901760, %v4648_v15 }
 0x28e   : > { %v2399_v17 = vpop.permute.xlu0 %2398 }
 0x28f   : > { %v2401_v58 = vpop.permute.xlu1 %2400  ;;  %v8043_v26 = vsub.f32 %v4650_v13, %v8031_v41  ;;  %v8046_v27 = vsub.f32 %v4648_v15, %v8033_v55  ;;  %4653 = vmatprep.subr.mxu0 %v8031_v41 }
 0x290   : > { %v2404_v30 = vsel %vm2402_vm11, %v2399_v17, %v2401_v58  ;;  %4655 = vmatpush1.msra.mxu0 %v8033_v55 }
 0x291   : > { %v2413_v32 = vsel %vm1322_vm5, %v2404_v30, 0  ;;  %v4749_v33 = vand.u32 4294901760, %v8046_v27  ;;  %4724 = vmatmul.mubr.f32.vlgmr.msra.gmra.mrb[2].mxu0 %v4723_v18  ;;  %v4743_v36 = vand.u32 4294901760, %v8043_v26 }
 0x292   : > { %v8053_v34 = vand.u32 4294901760, %v2413_v32  ;;  %4729 = vmatprep.mubr.f32.mxu0 %v7442_v1 }
 0x293   : > { %v4744_v38 = vsub.f32 %v8043_v26, %v4743_v36  ;;  %v4750_v43 = vsub.f32 %v8046_v27, %v4749_v33 }
 0x294   : > { %v8062_v37 = vsub.f32 %v2413_v32, %v8053_v34  ;;  %2416 = vmatprep.subr.mxu1 %v8053_v34  ;;  %v5722_v53 = vpop.permute.xlu1 %5721  ;;  %v6988_v32 = vld [vmem:[%s8530_s3 + $0x30] sm:$0xff] }
 0x295   : > { %v2397_v46 = vpop.permute.xlu0 %2396  ;;  %4735 = vmatmul.mubr.f32.gmra.mrb[4].mxu0 %v4734_v35  ;;  %v4745_v50 = vand.u32 4294901760, %v4744_v38  ;;  %v4751_v51 = vand.u32 4294901760, %v4750_v43  ;;  %v5730_v5 = vmul.f32 %v5722_v53, %v7606_v57 }
 0x296   : > { %v2403_v47 = vsel %vm2402_vm11, %v2397_v46, %v2399_v17  ;;  %v2506_v52 = vand.u32 4294901760, %v8062_v37  ;;  %4815 = vmatprep.mubr.f32.mxu0 %v7442_v1  ;;  %v5183_v17 = vsel %vm1315_vm3, %v6998_v29, 0 }
 0x297   : > { %v2411_v19 = vsel %vm1322_vm5, %v2403_v47, 0  ;;  %4746 = vmatprep.subr.mxu0 %v4745_v50 }
 0x298   : > { %v8078_v56 = vand.u32 4294901760, %v2411_v19  ;;  %v2507_v61 = vsub.f32 %v8062_v37, %v2506_v52  ;;  %4752 = vmatpush1.msra.mxu0 %v4751_v51 }
 0x299   : > { %v5724_v62 = vpop.permute.xlu0 %5723  ;;  %4817 = vmatmul.mubr.f32.vlgmr.msra.gmra.mrb[2].mxu0 %v7998_v4  ;;  %4832 = vmatprep.subr.mxu0 %v8043_v26 }
 0x29a   : > { %v8084_v2 = vsub.f32 %v2411_v19, %v8078_v56  ;;  %v5726_v45 = vsel %vm5725_vm12, %v5722_v53, %v5724_v62  ;;  %v5732_v3 = vmul.f32 %v5724_v62, %v7611_v60  ;;  %2418 = vmatpush1.msra.mxu1 %v8078_v56  ;;  %v2508_v20 = vand.u32 4294901760, %v2507_v61  ;;  %4835 = vmatpush1.msra.mxu0 %v8046_v27  ;;  %v5176_v60 = vpop.permute.xlu1 %5175 }
 0x29b   : > { %v5731_v25 = vmul.f32 %v5726_v45, %v7609_v59  ;;  %2487 = vmatmul.mubr.f32.vlgmr.msra.gmra.mrb[2].mxu1 %v2486_v48  ;;  %4916 = vmatprep.subr.mxu0 %v8031_v41 }
 0x29c   : > { %v2512_v63 = vand.u32 4294901760, %v8084_v2  ;;  %5743 = vrot.lane.b32.xlu0 %v5732_v3, %s7456_s17  ;;  %2492 = vmatprep.mubr.f32.mxu1 %v7442_v1 }
 0x29d   : > { %5741 = vrot.lane.b32.xlu1 %v5731_v25, %s7456_s17  ;;  %2509 = vmatprep.subr.mxu1 %v2508_v20 }
 0x29e   : > { %v2513_v59 = vsub.f32 %v8084_v2, %v2512_v63  ;;  %4822 = vmatprep.mubr.f32.mxu0 %v7442_v1  ;;  %v5178_v28 = vpop.permute.xlu0 %5177  ;;  %v5174_v9 = vpop.permute.xlu1 %5173 }
 0x29f   : > { %2498 = vmatmul.mubr.f32.gmra.mrb[4].mxu1 %v2497_v54  ;;  %4824 = vmatmul.mubr.f32.gmra.mrb[4].mxu0 %v8007_v49  ;;  %v5181_v57 = vsel %vm5179_vm13, %v5176_v60, %v5178_v28  ;;  %v5180_v18 = vsel %vm5179_vm13, %v5174_v9, %v5176_v60  ;;  %v6277_v28 = vld [vmem:[%s8531_s4 + $0x8] sm:$0xff] }
 0x2a0   : > { %v2514_v42 = vand.u32 4294901760, %v2513_v59  ;;  %2578 = vmatprep.mubr.f32.mxu1 %v7442_v1  ;;  %4898 = vmatprep.mubr.f32.mxu0 %v7442_v1  ;;  %v5190_v11 = vsel %vm1322_vm5, %v5181_v57, 0  ;;  %v5188_v58 = vsel %vm1322_vm5, %v5180_v18, 0 }
 0x2a1   : > { %5739 = vrot.lane.b32.xlu1 %v5730_v5, %s7456_s17  ;;  %v8123_v13 = vand.u32 4294901760, %v5190_v11 }
 0x2a2   : > { %2515 = vmatpush1.msra.mxu1 %v2514_v42  ;;  %v2966_v39 = vpop.permute.xlu1 %2965  ;;  %v2964_v15 = vpop.permute.xlu0 %2963  ;;  %v6276_v42 = vld [vmem:[%s8531_s4] sm:$0xff] }
 0x2a3   : > { %2580 = vmatmul.mubr.f32.vlgmr.msra.gmra.mrb[2].mxu1 %v8017_v23  ;;  %2595 = vmatprep.subr.mxu1 %v8062_v37  ;;  %v2969_v44 = vsel %vm2967_vm14, %v2964_v15, %v2966_v39  ;;  %v8146_v26 = vsub.f32 %v5190_v11, %v8123_v13  ;;  %v2971_v37 = vsel %vm1315_vm3, %v6988_v32, 0  ;;  %v6304_v11 = vsel %vm1322_vm5, %v7981_v0, 0  ;;  %v6292_v39 = vld [vmem:[%s8532_s5] sm:$0xff] }
 0x2a4   : > { %2598 = vmatpush1.msra.mxu1 %v8084_v2  ;;  %4901 = vmatmul.mubr.f32.vlgmr.msra.gmra.mrb[2].mxu0 %v8005_v40  ;;  %v6999_v40 = vld [vmem:[%s8530_s3 + $0x78] sm:$0xff]  ;;  %v2978_v27 = vsel %vm1322_vm5, %v2969_v44, 0  ;;  %v8309_v29 = vand.u32 4294901760, %v6304_v11  ;;  %v6295_v0 = vsel %vm1315_vm3, %v6292_v39, 0 }
 0x2a5   : > { %4918 = vmatpush1.msra.mxu0 %v8033_v55  ;;  %2679 = vmatprep.subr.mxu1 %v8053_v34  ;;  %v5186_v30 = vsel %vm1315_vm3, %v6999_v40, 0  ;;  %v8159_v35 = vand.u32 4294901760, %v2978_v27  ;;  %v8334_v18 = vand.u32 4294901760, %v6295_v0 }
 0x2a6   : > { %5003 = vmatprep.subr.mxu0 %v4743_v36  ;;  %2585 = vmatprep.mubr.f32.mxu1 %v7442_v1  ;;  %v5283_v36 = vand.u32 4294901760, %v8146_v26  ;;  %v8171_v16 = vand.u32 4294901760, %v5186_v30 }
 0x2a7   : > { %2587 = vmatmul.mubr.f32.gmra.mrb[4].mxu1 %v8027_v14  ;;  %4906 = vmatprep.mubr.f32.mxu0 %v7442_v1  ;;  %v8185_v38 = vsub.f32 %v2978_v27, %v8159_v35 }
 0x2a8   : > { %4909 = vmatmul.mubr.f32.gmra.mrb[4].mxu0 %v8015_v8  ;;  %2661 = vmatprep.mubr.f32.mxu1 %v7442_v1  ;;  %v8200_v47 = vsub.f32 %v5186_v30, %v8171_v16 }
 0x2a9   : > { %4981 = vmatprep.mubr.f32.mxu0 %v7442_v1  ;;  %v3071_v51 = vand.u32 4294901760, %v8185_v38 }
 0x2aa   : > { %v5272_v53 = vand.u32 4294901760, %v8200_v47 }
 0x2ab   : > { %2664 = vmatmul.mubr.f32.vlgmr.msra.gmra.mrb[2].mxu1 %v8025_v12  ;;  %v6989_v12 = vld [vmem:[%s8530_s3 + $0x38] sm:$0xff] }
 0x2ac   : > { %2681 = vmatpush1.msra.mxu1 %v8078_v56  ;;  %4985 = vmatmul.mubr.f32.vlgmr.msra.gmra.mrb[2].mxu0 %v4721_v6  ;;  %v8142_v6 = vand.u32 4294901760, %v5183_v17  ;;  %v5273_v3 = vsub.f32 %v8200_v47, %v5272_v53 }
 0x2ad   : > { %2766 = vmatprep.subr.mxu1 %v2506_v52  ;;  %5007 = vmatpush1.msra.mxu0 %v4749_v33  ;;  %v8157_v33 = vand.u32 4294901760, %v5188_v58 }
 0x2ae   : > { %5086 = vmatprep.subr.mxu0 %v8031_v41  ;;  %2669 = vmatprep.mubr.f32.mxu1 %v7442_v1  ;;  %v2962_v41 = vpop.permute.xlu0 %2961  ;;  %v8164_v8 = vsub.f32 %v5183_v17, %v8142_v6  ;;  %v5274_v60 = vand.u32 4294901760, %v5273_v3  ;;  %v6293_v17 = vld [vmem:[%s8532_s5 + $0x8] sm:$0xff] }
 0x2af   : > { %2672 = vmatmul.mubr.f32.gmra.mrb[4].mxu1 %v8040_v22  ;;  %4990 = vmatprep.mubr.f32.mxu0 %v7442_v1  ;;  %v2974_v22 = vsel %vm1315_vm3, %v6989_v12, 0 }
 0x2b0   : > { %4994 = vmatmul.mubr.f32.gmra.mrb[4].mxu0 %v4732_v10  ;;  %2744 = vmatprep.mubr.f32.mxu1 %v7442_v1  ;;  %v2968_v10 = vsel %vm2967_vm14, %v2962_v41, %v2964_v15  ;;  %v5261_v46 = vand.u32 4294901760, %v8164_v8  ;;  %v8212_v19 = vand.u32 4294901760, %v2974_v22  ;;  %v6301_v15 = vsel %vm1322_vm5, %v7979_v31, 0 }
 0x2b1   : > { %5070 = vmatprep.mubr.f32.mxu0 %v7442_v1  ;;  %v2976_v43 = vsel %vm1322_vm5, %v2968_v10, 0  ;;  %v8337_v44 = vand.u32 4294901760, %v6301_v15  ;;  %v6298_v31 = vsel %vm1315_vm3, %v6293_v17, 0 }
 0x2b2   : > { %v5262_v24 = vsub.f32 %v8164_v8, %v5261_v46  ;;  %v8236_v2 = vsub.f32 %v2974_v22, %v8212_v19 }
 0x2b3   : > { %2748 = vmatmul.mubr.f32.vlgmr.msra.gmra.mrb[2].mxu1 %v2484_v21  ;;  %v8182_v21 = vsub.f32 %v5188_v58, %v8157_v33  ;;  %v8345_v58 = vsub.f32 %v6295_v0, %v8334_v18  ;;  %v8351_v27 = vsub.f32 %v6301_v15, %v8337_v44 }
 0x2b4   : > { %2770 = vmatpush1.msra.mxu1 %v2512_v63  ;;  %5072 = vmatmul.mubr.f32.vlgmr.msra.gmra.mrb[2].mxu0 %v7998_v4  ;;  %v5263_v45 = vand.u32 4294901760, %v5262_v24 }
 0x2b5   : > { %2849 = vmatprep.subr.mxu1 %v8053_v34  ;;  %5088 = vmatpush1.msra.mxu0 %v8033_v55  ;;  %v8191_v55 = vand.u32 4294901760, %v2971_v37  ;;  %v5284_v34 = vsub.f32 %v8146_v26, %v5283_v36  ;;  %v5289_v50 = vand.u32 4294901760, %v8182_v21  ;;  %v6375_v30 = vand.u32 4294901760, %v8345_v58 }
 0x2b6   : > { %5193 = vmatprep.subr.mxu0 %v8123_v13  ;;  %2753 = vmatprep.mubr.f32.mxu1 %v7442_v1 }
 0x2b7   : > { %2757 = vmatmul.mubr.f32.gmra.mrb[4].mxu1 %v2495_v7  ;;  %5077 = vmatprep.mubr.f32.mxu0 %v7442_v1  ;;  %v8204_v7 = vand.u32 4294901760, %v2976_v43  ;;  %v8210_v52 = vsub.f32 %v2971_v37, %v8191_v55  ;;  %v5285_v48 = vand.u32 4294901760, %v5284_v34 }
 0x2b8   : > { %5079 = vmatmul.mubr.f32.gmra.mrb[4].mxu0 %v8007_v49  ;;  %2833 = vmatprep.mubr.f32.mxu1 %v7442_v1 }
 0x2b9   : > { %5151 = vmatprep.mubr.f32.mxu0 %v7442_v1  ;;  %v8223_v61 = vsub.f32 %v2976_v43, %v8204_v7  ;;  %v3049_v62 = vand.u32 4294901760, %v8210_v52  ;;  %v7002_v43 = vld [vmem:[%s8530_s3 + $0x88] sm:$0xff] }
 0x2ba   : > { %v5752_v34 = vsel %vm1315_vm3, %v7002_v43, 0 }
 0x2bb   : > { %2835 = vmatmul.mubr.f32.vlgmr.msra.gmra.mrb[2].mxu1 %v8017_v23  ;;  %v3077_v20 = vand.u32 4294901760, %v8223_v61  ;;  %v3050_v63 = vsub.f32 %v8210_v52, %v3049_v62 }
 0x2bc   : > { %2851 = vmatpush1.msra.mxu1 %v8078_v56  ;;  %5153 = vmatmul.mubr.f32.vlgmr.msra.gmra.mrb[2].mxu0 %v7998_v4  ;;  %v3072_v4 = vsub.f32 %v8185_v38, %v3071_v51  ;;  %v5290_v56 = vsub.f32 %v8182_v21, %v5289_v50 }
 0x2bd   : > { %2981 = vmatprep.subr.mxu1 %v8159_v35  ;;  %5195 = vmatpush1.msra.mxu0 %v8157_v33  ;;  %v3051_v59 = vand.u32 4294901760, %v3050_v63 }
 0x2be   : > { %5286 = vmatprep.subr.mxu0 %v5285_v48  ;;  %2840 = vmatprep.mubr.f32.mxu1 %v7442_v1  ;;  %v3073_v25 = vand.u32 4294901760, %v3072_v4  ;;  %v5291_v54 = vand.u32 4294901760, %v5290_v56 }
 0x2bf   : > { %2842 = vmatmul.mubr.f32.gmra.mrb[4].mxu1 %v8027_v14  ;;  %5158 = vmatprep.mubr.f32.mxu0 %v7442_v1 }
 0x2c0   : > { %5160 = vmatmul.mubr.f32.gmra.mrb[4].mxu0 %v8007_v49  ;;  %2914 = vmatprep.mubr.f32.mxu1 %v7442_v1  ;;  %v3060_v49 = vand.u32 4294901760, %v8236_v2 }
 0x2c1   : > { %5258 = vmatprep.mubr.f32.mxu0 %v7442_v1 }
 0x2c2   : > { %v3061_v5 = vsub.f32 %v8236_v2, %v3060_v49 }
 0x2c3   : > { %2916 = vmatmul.mubr.f32.vlgmr.msra.gmra.mrb[2].mxu1 %v8017_v23  ;;  %v3078_v23 = vsub.f32 %v8223_v61, %v3077_v20 }
 0x2c4   : > { %2983 = vmatpush1.msra.mxu1 %v8204_v7  ;;  %5264 = vmatmul.mubr.f32.vlgmr.msra.gmra.mrb[2].mxu0 %v5263_v45  ;;  %v3062_v57 = vand.u32 4294901760, %v3061_v5 }
 0x2c5   : > { %3074 = vmatprep.subr.mxu1 %v3073_v25  ;;  %5292 = vmatpush1.msra.mxu0 %v5291_v54  ;;  %v3079_v9 = vand.u32 4294901760, %v3078_v23 }
 0x2c6   : > { %5372 = vmatprep.subr.mxu0 %v8146_v26  ;;  %2921 = vmatprep.mubr.f32.mxu1 %v7442_v1  ;;  %v8347_v26 = vand.u32 4294901760, %v6298_v31 }
 0x2c7   : > { %2923 = vmatmul.mubr.f32.gmra.mrb[4].mxu1 %v8027_v14  ;;  %5269 = vmatprep.mubr.f32.mxu0 %v7442_v1  ;;  %v7457_v14 = vmov 0  }
 0x2c8   : > { %5275 = vmatmul.mubr.f32.gmra.mrb[4].mxu0 %v5274_v60  ;;  %3046 = vmatprep.mubr.f32.mxu1 %v7442_v1  ;;  %v8361_v32 = vsub.f32 %v6298_v31, %v8347_v26 }
 0x2c9   : > { %5355 = vmatprep.mubr.f32.mxu0 %v7442_v1  ;;  %7366 = vset.pattern.permute.xlu0 %v7457_v14 }
 0x2ca   : > { %6280 = vperm.xlu0 %7366, %v6276_v42   ;;  %7367 = vset.pattern.permute.xlu1 %v7457_v14 }
 0x2cb   : > { %3052 = vmatmul.mubr.f32.vlgmr.msra.gmra.mrb[2].mxu1 %v3051_v59  ;;  %6285 = vperm.xlu1 %7367, %v6277_v28  }
 0x2cc   : > { %3080 = vmatpush1.msra.mxu1 %v3079_v9  ;;  %5357 = vmatmul.mubr.f32.vlgmr.msra.gmra.mrb[2].mxu0 %v8142_v6 }
 0x2cd   : > { %3160 = vmatprep.subr.mxu1 %v8185_v38  ;;  %5375 = vmatpush1.msra.mxu0 %v8182_v21  ;;  %v7001_v21 = vld [vmem:[%s8530_s3 + $0x80] sm:$0xff] }
 0x2ce   : > { %5456 = vmatprep.subr.mxu0 %v8123_v13  ;;  %3057 = vmatprep.mubr.f32.mxu1 %v7442_v1  ;;  %v5749_v38 = vsel %vm1315_vm3, %v7001_v21, 0 }
 0x2cf   : > { %3063 = vmatmul.mubr.f32.gmra.mrb[4].mxu1 %v3062_v57  ;;  %5362 = vmatprep.mubr.f32.mxu0 %v7442_v1 }
 0x2d0   : > { %5364 = vmatmul.mubr.f32.gmra.mrb[4].mxu0 %v8171_v16  ;;  %3143 = vmatprep.mubr.f32.mxu1 %v7442_v1 }
 0x2d1   : > { %5438 = vmatprep.mubr.f32.mxu0 %v7442_v1 }
 0x2d3   : > { %3145 = vmatmul.mubr.f32.vlgmr.msra.gmra.mrb[2].mxu1 %v8191_v55 }
 0x2d4   : > { %3163 = vmatpush1.msra.mxu1 %v8223_v61  ;;  %5441 = vmatmul.mubr.f32.vlgmr.msra.gmra.mrb[2].mxu0 %v8164_v8  ;;  %v6386_v8 = vand.u32 4294901760, %v8361_v32 }
 0x2d5   : > { %3244 = vmatprep.subr.mxu1 %v8159_v35  ;;  %5458 = vmatpush1.msra.mxu0 %v8157_v33 }
 0x2d6   : > { %5543 = vmatprep.subr.mxu0 %v5283_v36  ;;  %3150 = vmatprep.mubr.f32.mxu1 %v7442_v1 }
 0x2d7   : > { %3152 = vmatmul.mubr.f32.gmra.mrb[4].mxu1 %v8212_v19  ;;  %5446 = vmatprep.mubr.f32.mxu0 %v7442_v1 }
 0x2d8   : > { %5449 = vmatmul.mubr.f32.gmra.mrb[4].mxu0 %v8200_v47  ;;  %3226 = vmatprep.mubr.f32.mxu1 %v7442_v1  ;;  %v8398_v47 = vand.u32 4294901760, %v5752_v34 }
 0x2d9   : > { %5521 = vmatprep.mubr.f32.mxu0 %v7442_v1 }
 0x2db   : > { %3229 = vmatmul.mubr.f32.vlgmr.msra.gmra.mrb[2].mxu1 %v8210_v52 }
 0x2dc   : > { %3246 = vmatpush1.msra.mxu1 %v8204_v7  ;;  %5525 = vmatmul.mubr.f32.vlgmr.msra.gmra.mrb[2].mxu0 %v5261_v46 }
 0x2dd   : > { %3331 = vmatprep.subr.mxu1 %v3071_v51  ;;  %5547 = vmatpush1.msra.mxu0 %v5289_v50 }
 0x2de   : > { %5626 = vmatprep.subr.mxu0 %v8123_v13  ;;  %3234 = vmatprep.mubr.f32.mxu1 %v7442_v1  ;;  %v8325_v13 = vsub.f32 %v6304_v11, %v8309_v29 }
 0x2df   : > { %3237 = vmatmul.mubr.f32.gmra.mrb[4].mxu1 %v8236_v2  ;;  %5530 = vmatprep.mubr.f32.mxu0 %v7442_v1 }
 0x2e0   : > { %5534 = vmatmul.mubr.f32.gmra.mrb[4].mxu0 %v5272_v53  ;;  %3309 = vmatprep.mubr.f32.mxu1 %v7442_v1  ;;  %v6397_v40 = vand.u32 4294901760, %v8325_v13 }
 0x2e1   : > { %5610 = vmatprep.mubr.f32.mxu0 %v7442_v1 }
 0x2e2   : > { %v6398_v41 = vsub.f32 %v8325_v13, %v6397_v40 }
 0x2e3   : > { %3313 = vmatmul.mubr.f32.vlgmr.msra.gmra.mrb[2].mxu1 %v3049_v62 }
 0x2e4   : > { %3335 = vmatpush1.msra.mxu1 %v3077_v20  ;;  %5612 = vmatmul.mubr.f32.vlgmr.msra.gmra.mrb[2].mxu0 %v8142_v6 }
 0x2e5   : > { %3414 = vmatprep.subr.mxu1 %v8159_v35  ;;  %5628 = vmatpush1.msra.mxu0 %v8157_v33  ;;  %v6403_v33 = vand.u32 4294901760, %v8351_v27  ;;  %v6399_v35 = vand.u32 4294901760, %v6398_v41 }
 0x2e6   : > { %3318 = vmatprep.mubr.f32.mxu1 %v7442_v1  ;;  %5617 = vmatprep.mubr.f32.mxu0 %v7442_v1 }
 0x2e7   : > { %3322 = vmatmul.mubr.f32.gmra.mrb[4].mxu1 %v3060_v49  ;;  %v6404_v10 = vsub.f32 %v8351_v27, %v6403_v33 }
 0x2e8   : > { %3398 = vmatprep.mubr.f32.mxu1 %v7442_v1  ;;  %5619 = vmatmul.mubr.f32.gmra.mrb[4].mxu0 %v8171_v16 }
 0x2e9   : > { %5691 = vmatprep.mubr.f32.mxu0 %v7442_v1  ;;  %v6405_v37 = vand.u32 4294901760, %v6404_v10 }
 0x2eb   : > { %3400 = vmatmul.mubr.f32.vlgmr.msra.gmra.mrb[2].mxu1 %v8191_v55 }
 0x2ec   : > { %3416 = vmatpush1.msra.mxu1 %v8204_v7  ;;  %3405 = vmatprep.mubr.f32.mxu1 %v7442_v1  ;;  %v8405_v7 = vsub.f32 %v5752_v34, %v8398_v47 }
 0x2ed   : > { %6307 = vmatprep.subr.mxu1 %v8309_v29  ;;  %5693 = vmatmul.mubr.f32.vlgmr.msra.gmra.mrb[2].mxu0 %v8142_v6  ;;  %v6376_v6 = vsub.f32 %v8345_v58, %v6375_v30 }
 0x2ee   : > { %5698 = vmatprep.mubr.f32.mxu0 %v7442_v1  ;;  %v5838_v24 = vand.u32 4294901760, %v8405_v7 }
 0x2ef   : > { %3407 = vmatmul.mubr.f32.gmra.mrb[4].mxu1 %v8212_v19  ;;  %v6377_v36 = vand.u32 4294901760, %v6376_v6 }
 0x2f0   : > { %3479 = vmatprep.mubr.f32.mxu1 %v7442_v1  ;;  %v5839_v45 = vsub.f32 %v8405_v7, %v5838_v24 }
 0x2f1   : > { %5700 = vmatmul.mubr.f32.gmra.mrb[4].mxu0 %v8171_v16  ;;  %v6387_v16 = vsub.f32 %v8361_v32, %v6386_v8 }
 0x2f2   : > { %5824 = vmatprep.mubr.f32.mxu0 %v7442_v1  ;;  %v5840_v63 = vand.u32 4294901760, %v5839_v45 }
 0x2f3   : > { %3481 = vmatmul.mubr.f32.vlgmr.msra.gmra.mrb[2].mxu1 %v8191_v55  ;;  %v6388_v12 = vand.u32 4294901760, %v6387_v16  ;;  %v8390_v55 = vand.u32 4294901760, %v5749_v38 }
 0x2f4   : > { %3486 = vmatprep.mubr.f32.mxu1 %v7442_v1  ;;  %6309 = vmatpush1.msra.mxu1 %v8337_v44 }
 0x2f5   : > { %6400 = vmatprep.subr.mxu1 %v6399_v35  ;;  %v8396_v46 = vsub.f32 %v5749_v38, %v8390_v55 }
 0x2f7   : > { %3488 = vmatmul.mubr.f32.gmra.mrb[4].mxu1 %v8212_v19  ;;  %v5827_v22 = vand.u32 4294901760, %v8396_v46 }
 0x2f8   : > { %6372 = vmatprep.mubr.f32.mxu1 %v7442_v1 }
 0x2f9   : > { %v5828_v48 = vsub.f32 %v8396_v46, %v5827_v22 }
 0x2fb   : > { %6378 = vmatmul.mubr.f32.vlgmr.msra.gmra.mrb[6].mxu1 %v6377_v36  ;;  %v5829_v2 = vand.u32 4294901760, %v5828_v48 }
 0x2fc   : > { %6406 = vmatpush1.msra.mxu1 %v6405_v37  ;;  %6383 = vmatprep.mubr.f32.mxu1 %v7442_v1 }
 0x2fd   : > { %6486 = vmatprep.subr.mxu1 %v8325_v13 }
 0x2ff   : > { %6389 = vmatmul.mubr.f32.gmra.mrb[8].mxu1 %v6388_v12 }
 0x300   : > { %6469 = vmatprep.mubr.f32.mxu1 %v7442_v1 }
 0x303   : > { %6471 = vmatmul.mubr.f32.vlgmr.msra.gmra.mrb[6].mxu1 %v8334_v18 }
 0x304   : > { %6489 = vmatpush1.msra.mxu1 %v8351_v27  ;;  %6476 = vmatprep.mubr.f32.mxu1 %v7442_v1 }
 0x305   : > { %6570 = vmatprep.subr.mxu1 %v8309_v29 }
 0x307   : > { %6478 = vmatmul.mubr.f32.gmra.mrb[8].mxu1 %v8347_v26 }
 0x308   : > { %6552 = vmatprep.mubr.f32.mxu1 %v7442_v1 }
 0x30b   : > { %6555 = vmatmul.mubr.f32.vlgmr.msra.gmra.mrb[6].mxu1 %v8345_v58 }
 0x30c   : > { %6572 = vmatpush1.msra.mxu1 %v8337_v44  ;;  %6560 = vmatprep.mubr.f32.mxu1 %v7442_v1 }
 0x30d   : > { %6657 = vmatprep.subr.mxu1 %v6397_v40 }
 0x30e   : > { %v5744_v50 = vpop.permute.xlu0 %5743 }
 0x30f   : > { %v5742_v51 = vpop.permute.xlu1 %5741  ;;  %6563 = vmatmul.mubr.f32.gmra.mrb[8].mxu1 %v8361_v32 }
 0x310   : > { %v5747_v52 = vsel %vm5745_vm15, %v5742_v51, %v5744_v50  ;;  %6635 = vmatprep.mubr.f32.mxu1 %v7442_v1 }
 0x311   : > { %v5756_v19 = vsel %vm1322_vm5, %v5747_v52, 0 }
 0x312   : > { %v5758_v53 = vand.u32 4294901760, %v5756_v19 }
 0x313   : > { %v5740_v61 = vpop.permute.xlu1 %5739  ;;  %6639 = vmatmul.mubr.f32.vlgmr.msra.gmra.mrb[6].mxu1 %v6375_v30 }
 0x314   : > { %v5848_v4 = vsub.f32 %v5756_v19, %v5758_v53  ;;  %v5746_v56 = vsel %vm5745_vm15, %v5740_v61, %v5742_v51  ;;  %6661 = vmatpush1.msra.mxu1 %v6403_v33  ;;  %5759 = vmatprep.subr.mxu0 %v5758_v53 }
 0x315   : > { %v5754_v62 = vsel %vm1322_vm5, %v5746_v56, 0  ;;  %6740 = vmatprep.subr.mxu1 %v8309_v29  ;;  %6644 = vmatprep.mubr.f32.mxu1 %v7442_v1 }
 0x316   : > { %v5760_v3 = vand.u32 4294901760, %v5754_v62  ;;  %v5849_v20 = vand.u32 4294901760, %v5848_v4 }
 0x317   : > { %6648 = vmatmul.mubr.f32.gmra.mrb[8].mxu1 %v6386_v8 }
 0x318   : > { %v5854_v25 = vsub.f32 %v5754_v62, %v5760_v3  ;;  %5761 = vmatpush1.msra.mxu0 %v5760_v3  ;;  %6724 = vmatprep.mubr.f32.mxu1 %v7442_v1  ;;  %v5850_v54 = vsub.f32 %v5848_v4, %v5849_v20 }
 0x319   : > { %5830 = vmatmul.mubr.f32.vlgmr.msra.gmra.mrb[2].mxu0 %v5829_v2 }
 0x31a   : > { %v5855_v49 = vand.u32 4294901760, %v5854_v25  ;;  %5835 = vmatprep.mubr.f32.mxu0 %v7442_v1  ;;  %v5851_v60 = vand.u32 4294901760, %v5850_v54 }
 0x31b   : > { %6726 = vmatmul.mubr.f32.vlgmr.msra.gmra.mrb[6].mxu1 %v8334_v18 }
 0x31c   : > { %6742 = vmatpush1.msra.mxu1 %v8337_v44  ;;  %5852 = vmatprep.subr.mxu0 %v5851_v60  ;;  %v5856_v23 = vsub.f32 %v5854_v25, %v5855_v49 }
 0x31d   : > { %5841 = vmatmul.mubr.f32.gmra.mrb[4].mxu0 %v5840_v63  ;;  %6731 = vmatprep.mubr.f32.mxu1 %v7442_v1 }
 0x31e   : > { %v5857_v59 = vand.u32 4294901760, %v5856_v23  ;;  %5921 = vmatprep.mubr.f32.mxu0 %v7442_v1 }
 0x31f   : > { %6733 = vmatmul.mubr.f32.gmra.mrb[8].mxu1 %v8347_v26 }
 0x320   : > { %5858 = vmatpush1.msra.mxu0 %v5857_v59  ;;  %6805 = vmatprep.mubr.f32.mxu1 %v7442_v1 }
 0x321   : > { %5923 = vmatmul.mubr.f32.vlgmr.msra.gmra.mrb[2].mxu0 %v8390_v55  ;;  %5938 = vmatprep.subr.mxu0 %v5848_v4 }
 0x322   : > { %5941 = vmatpush1.msra.mxu0 %v5854_v25  ;;  %5928 = vmatprep.mubr.f32.mxu0 %v7442_v1 }
 0x323   : > { %6022 = vmatprep.subr.mxu0 %v5758_v53  ;;  %6807 = vmatmul.mubr.f32.vlgmr.msra.gmra.mrb[6].mxu1 %v8334_v18 }
 0x324   : > { %6812 = vmatprep.mubr.f32.mxu1 %v7442_v1 }
 0x325   : > { %5930 = vmatmul.mubr.f32.gmra.mrb[4].mxu0 %v8398_v47 }
 0x326   : > { %6004 = vmatprep.mubr.f32.mxu0 %v7442_v1 }
 0x327   : > { %6814 = vmatmul.mubr.f32.gmra.mrb[8].mxu1 %v8347_v26 }
 0x329   : > { %6007 = vmatmul.mubr.f32.vlgmr.msra.gmra.mrb[2].mxu0 %v8396_v46 }
 0x32a   : > { %6024 = vmatpush1.msra.mxu0 %v5760_v3  ;;  %6012 = vmatprep.mubr.f32.mxu0 %v7442_v1 }
 0x32b   : > { %6109 = vmatprep.subr.mxu0 %v5849_v20 }
 0x32d   : > { %6015 = vmatmul.mubr.f32.gmra.mrb[4].mxu0 %v8405_v7 }
 0x32e   : > { %6087 = vmatprep.mubr.f32.mxu0 %v7442_v1 }
 0x331   : > { %6091 = vmatmul.mubr.f32.vlgmr.msra.gmra.mrb[2].mxu0 %v5827_v22 }
 0x332   : > { %6113 = vmatpush1.msra.mxu0 %v5855_v49  ;;  %6096 = vmatprep.mubr.f32.mxu0 %v7442_v1 }
 0x333   : > { %6192 = vmatprep.subr.mxu0 %v5758_v53 }
 0x335   : > { %6100 = vmatmul.mubr.f32.gmra.mrb[4].mxu0 %v5838_v24 }
 0x336   : > { %6176 = vmatprep.mubr.f32.mxu0 %v7442_v1 }
 0x339   : > { %6178 = vmatmul.mubr.f32.vlgmr.msra.gmra.mrb[2].mxu0 %v8390_v55 }
 0x33a   : > { %6194 = vmatpush1.msra.mxu0 %v5760_v3  ;;  %6183 = vmatprep.mubr.f32.mxu0 %v7442_v1 }
 0x33d   : > { %6185 = vmatmul.mubr.f32.gmra.mrb[4].mxu0 %v8398_v47 }
 0x33e   : > { %6257 = vmatprep.mubr.f32.mxu0 %v7442_v1 }
 0x341   : > { %6259 = vmatmul.mubr.f32.vlgmr.msra.gmra.mrb[2].mxu0 %v8390_v55 }
 0x342   : > { %6264 = vmatprep.mubr.f32.mxu0 %v7442_v1 }
 0x345   : > { %6266 = vmatmul.mubr.f32.gmra.mrb[4].mxu0 %v8398_v47 }
 0x349   : > { %v6281_v15 = vpop.permute.xlu0 %6280 }
 0x34a   : > { %v6286_v58 = vpop.permute.xlu1 %6285 }
 0x3c6   : > { %v3482_v5 = vpop.f32.mrb[2].mxu1 }
 0x3c7   : > { %v3484_v42 = vpop.f32.mrb[3].mxu1 }
 0x3ca   : > { %v3489_v28 = vpop.f32.mrb[4].mxu1 }
 0x3cb   : > { %v3491_v14 = vpop.f32.mrb[5].mxu1 }
 0x3f6   : > { %v8444_v9 = vpop.f32.mrb[6].mxu1 }
 0x3f7   : > { %v8446_v57 = vpop.f32.mrb[7].mxu1 }
 0x3f8   : > { %v6828_v11 = vadd.f32 %v8446_v57, %v8444_v9 }
 0x3fa   : > { %v8450_v29 = vpop.f32.mrb[8].mxu1 }
 0x3fb   : > { %v8452_v39 = vpop.f32.mrb[9].mxu1 }
 0x3fc   : > { %v6831_v1 = vadd.f32 %v8452_v39, %v8450_v29 }
 0x414   : > { %v6260_v0 = vpop.f32.mrb[2].mxu0 }
 0x415   : > { %v7058_v13 = vadd.f32 %v6260_v0, %v3482_v5  ;;  %v6262_v17 = vpop.f32.mrb[3].mxu0 }
 0x416   : > { %v7059_v18 = vadd.f32 %v6262_v17, %v3484_v42 }
 0x417   : > { %v8456_v44 = vadd.f32 %v7058_v13, %v6281_v15 }
 0x418   : > { %v8458_v31 = vadd.f32 %v7059_v18, %v6281_v15  ;;  %v6267_v40 = vpop.f32.mrb[4].mxu0 }
 0x419   : > { %v7060_v26 = vadd.f32 %v6267_v40, %v3489_v28  ;;  %v6269_v27 = vpop.f32.mrb[5].mxu0 }
 0x41a   : > { %v7061_v41 = vadd.f32 %v6269_v27, %v3491_v14  ;;  %v6820_v30 = vadd.f32 %v8458_v31, %v8456_v44 }
 0x41b   : > { %v8462_v32 = vadd.f32 %v7060_v26, %v6286_v58 }
 0x41c   : > { %v8464_v33 = vadd.f32 %v7061_v41, %v6286_v58  ;;  %6821 = vadd.xlane.f32.xlu1 %v6820_v30 }
 0x41e   : > { %v6823_v35 = vadd.f32 %v8464_v33, %v8462_v32 }
 0x420   : > { %6824 = vadd.xlane.f32.xlu0 %v6823_v35  ;;  %6832 = vadd.xlane.f32.xlu1 %v6831_v1 }
 0x424   : > { %6829 = vadd.xlane.f32.xlu0 %v6828_v11 }
 0x4a9   : > { %v6822_v6 = vpop.xlane.xlu1 %6821 }
 0x4aa   : > { %v6826_v10 = vmul.f32 0.00390625, %v6822_v6 }
 0x4ad   : > { %v6825_v8 = vpop.xlane.xlu0 %6824  ;;  %v6833_v16 = vpop.xlane.xlu1 %6832 }
 0x4ae   : > { %v6827_v36 = vmul.f32 0.00390625, %v6825_v8  ;;  %v6835_v21 = vmul.f32 0.00390625, %v6833_v16 }
 0x4b0   : > { %v6836_v37 = vmax.f32 %v6826_v10, %v6827_v36 }
 0x4b1   : > { %v6830_v12 = vpop.xlane.xlu0 %6829 }
 0x4b2   : > { %v6837_v38 = vrot.slane %v6836_v37, 4  ;;  %v6834_v43 = vmul.f32 0.00390625, %v6830_v12 }
 0x4b4   : > { %v6838_v55 = vmax.f32 %v6836_v37, %v6837_v38  ;;  %v6843_v34 = vmax.f32 %v6834_v43, %v6835_v21 }
 0x4b6   : > { %v6839_v46 = vrot.slane %v6838_v55, 2  ;;  %v6844_v47 = vrot.slane %v6843_v34, 4 }
 0x4b8   : > { %v6840_v22 = vmax.f32 %v6838_v55, %v6839_v46  ;;  %v6845_v7 = vmax.f32 %v6843_v34, %v6844_v47 }
 0x4ba   : > { %v6846_v50 = vrot.slane %v6845_v7, 2  ;;  %v6841_v51 = vrot.slane %v6840_v22, 1 }
 0x4bc   : > { %v6847_v52 = vmax.f32 %v6845_v7, %v6846_v50  ;;  %v6842_v48 = vmax.f32 %v6840_v22, %v6841_v51 }
 0x4be   : > { %v6848_v19 = vrot.slane %v6847_v52, 1 }
 0x4c0   : > { %v6849_v24 = vmax.f32 %v6847_v52, %v6848_v19 }
 0x4c2   : > { %v6850_v53 = vmax.f32 %v6842_v48, %v6849_v24 }
 0x4c4   : > { %v6851_v61 = vsub.f32 %v6826_v10, %v6850_v53  ;;  %v6852_v4 = vsub.f32 %v6827_v36, %v6850_v53  ;;  %v6857_v56 = vsub.f32 %v6834_v43, %v6850_v53  ;;  %v6858_v62 = vsub.f32 %v6835_v21, %v6850_v53 }
 0x4c6   : > { %v6853_v2 = vmul.f32 1.442695, %v6851_v61  ;;  %v6855_v45 = vmul.f32 1.442695, %v6852_v4  ;;  %v6859_v3 = vmul.f32 1.442695, %v6857_v56 }
 0x4c7   : > { %v6861_v20 = vmul.f32 1.442695, %v6858_v62 }
 0x4c8   : > { %7368 = vpow2.f32 %v6853_v2 }
 0x4c9   : > { %7370 = vpow2.f32 %v6855_v45 }
 0x4ca   : > { %7372 = vpow2.f32 %v6859_v3 }
 0x4cb   : > { %7374 = vpow2.f32 %v6861_v20 }
 0x4d2   : > { %v7369_v25 = vpop.eup %7368 }
 0x4d3   : > { %v7371_v54 = vpop.eup %7370 }
 0x4d4   : > { %v7373_v63 = vpop.eup %7372  ;;  %v6863_v49 = vadd.f32 %v7371_v54, %v7369_v25 }
 0x4d5   : > { %v7375_v60 = vpop.eup %7374 }
 0x4d6   : > { %v6864_v23 = vrot.slane %v6863_v49, 4  ;;  %v6870_v59 = vadd.f32 %v7375_v60, %v7373_v63 }
 0x4d8   : > { %v6865_v5 = vadd.f32 %v6864_v23, %v6863_v49  ;;  %v6871_v42 = vrot.slane %v6870_v59, 4 }
 0x4da   : > { %v6866_v28 = vrot.slane %v6865_v5, 2  ;;  %v6872_v14 = vadd.f32 %v6871_v42, %v6870_v59 }
 0x4dc   : > { %v6867_v11 = vadd.f32 %v6866_v28, %v6865_v5  ;;  %v6873_v1 = vrot.slane %v6872_v14, 2 }
 0x4de   : > { %v6868_v0 = vrot.slane %v6867_v11, 1  ;;  %v6874_v15 = vadd.f32 %v6873_v1, %v6872_v14 }
 0x4e0   : > { %v6869_v13 = vadd.f32 %v6868_v0, %v6867_v11  ;;  %v6875_v17 = vrot.slane %v6874_v15, 1 }
 0x4e2   : > { %v6876_v18 = vadd.f32 %v6875_v17, %v6874_v15 }
 0x4e4   : > { %v6877_v40 = vadd.f32 %v6876_v18, %v6869_v13 }
 0x4e6   : > { %7376 = vrcp.f32 %v6877_v40 }
 0x4f0   : > { %v7377_v58 = vpop.eup %7376 }
 0x4f1   : > { %v6879_v26 = vmul.f32 %v7377_v58, %v7369_v25  ;;  %v6881_v27 = vmul.f32 %v7377_v58, %v7373_v63  ;;  %v6880_v41 = vmul.f32 %v7377_v58, %v7371_v54  ;;  %v6882_v30 = vmul.f32 %v7377_v58, %v7375_v60 }
 0x4f3   : > { %v6883_v35 = vmul.f32 %v6879_v26, %v8456_v44  ;;  %v6884_v6 = vmul.f32 %v6879_v26, %v8458_v31  ;;  %v6887_v8 = vmul.f32 %v6881_v27, %v8444_v9  ;;  %v6888_v10 = vmul.f32 %v6881_v27, %v8446_v57 }
 0x4f4   : > { %v6885_v36 = vmul.f32 %v6880_v41, %v8462_v32  ;;  %v6886_v16 = vmul.f32 %v6880_v41, %v8464_v33  ;;  %v6889_v37 = vmul.f32 %v6882_v30, %v8450_v29  ;;  %v6890_v12 = vmul.f32 %v6882_v30, %v8452_v39 }
 0x4f5   : > { %v6891_v21 = vadd.f32 %v6887_v8, %v6883_v35  ;;  %v6892_v38 = vadd.f32 %v6888_v10, %v6884_v6 }
 0x4f6   : > { %v6893_v9 = vadd.f32 %v6889_v37, %v6885_v36  ;;  %v6894_v57 = vadd.f32 %v6890_v12, %v6886_v16 }
 0x4f7   : > { %6895 = vst [vmem:[%s271_s15] sm:$0xff] %v6891_v21  ;;  %6896 = vst [vmem:[%s271_s15 + $0x8] sm:$0xff] %v6892_v38 }
 0x4f8   : > { %6897 = vst [vmem:[%s271_s15 + $0x10] sm:$0xff] %v6893_v9  ;;  %6898 = vst [vmem:[%s271_s15 + $0x18] sm:$0xff] %v6894_v57 }
 0x4f9   : > { %7391 = shalt.err (!%p7388_p3)
}
 0x4fa   : > { %s7392_s8 = scalar_lea.hbm %s8481_s18, 512  ;;  %s7396_s14 = scalar_lea.hbm %s8534_s7, 1024 }
 0x4fb   : > { %p7393_p4 = scmp.ne.s32.totalorder %s8481_s18, %s7392_s8  ;;  %p7397_p9 = scmp.lt.u32.totalorder %s8481_s18, %s8534_s7 }
 0x4fc   : > { %p7398_p10 = scmp.lt.u32.totalorder %s7396_s14, %s7392_s8  ;;  %p7400_p12 = scmp.lt.u32.totalorder %s7392_s8, %s8481_s18 }
 0x4fd   : > { %p7394_p7 = pnand %p7393_p4, %p7538_p5 }
 0x4fe   : > { %p7399_p11 = por %p7398_p10, %p7397_p9 }
 0x4ff   : > { %p7395_p8 = pneg %p7394_p7 }
 0x500   : > { %p7401_p13 = por %p7400_p12, %p7399_p11 }
 0x502   : > { %p7402_p0 = pnand %p7401_p13, %p7395_p8 }
 0x504   : > { %7405 = shalt.err (!%p7402_p0)
}
 0x505   : > { %s7459_s17 = smov 256  }
 0x506   : > { %7310 = dma.vmem_to_hbm [thread:$0]  (%p7538_p5), %s8483_s16, 512, %s8481_s18, %s8485_s19, %s7459_s17, %s7459_s17, %s7450_s23  }
 0x507 PF: > { %p7316_p1 = scmp.ge.s32.totalorder %s7440_s27, 2  ;;  %s6928_s20 = sand.u32 1, %s7428_s24  }
 0x508   : > { %s6929_s21 = scalar_lea.sflag [#allocation3], %s6928_s20 }
 0x509   : > { %p7313_p2 = pnand %p7316_p1, %p7542_p6 }
 0x50b   : > { %7423 = dma.done.wait (!%p7313_p2), %s6929_s21, 512  }
 0x50c   : > { %7425 = vsyncadd (!%p7313_p2), %s6929_s21, 4294966784  ;;  %p17_p3 = scmp.ge.s32.totalorder %s7525_s30, 4   ;;  %s8537_s24 = smov %s7432_s25 }
 0x50d   : > { %s8538_s25 = smov %s7436_s26  ;;  %s8539_s26 = smov %s7536_s10 }
 0x50e   : > { %s8540_s27 = smov %s7525_s30  ;;  %19 = sbr.rel (!%p17_p3) target bundleno = 3 (0x3), region = 96 }
 0x515   :  { %6934 = vsyncpa [#allocation3], 1 }
 0x516   :  { %6936 = vsyncpa [#allocation3 + $0x1], 1 }

</bundles_post_ra>
